<compile_context>
chip_gen: v5e
topology: v5e:2x2
jax: 0.10.0
libtpu: 0.0.40
codegen_flags: <defaults>
</compile_context>

<pallas_src>
import functools

import jax
import jax.numpy as jnp
import numpy as np
from jax import lax
from jax.experimental import pallas as pl
from jax.experimental.pallas import tpu as pltpu


def _round_up(x, m):
    return -(-x // m) * m


def _sigmoid(x):
    # sigmoid(x) = 0.5*tanh(0.5*x) + 0.5 : single EUP op per vreg (mul/add go to the
    # 4-wide VALU which has slack), mathematically identical to the exact sigmoid.
    return 0.5 * jnp.tanh(0.5 * x) + 0.5


def lstm_chunk_kernel(len_ref, x_ref, wih_ref, whh_ref, b_ref,
                      h_out_ref, xg_scr, h_scr, c_scr, *, unroll):
    """One (batch-block, time-chunk) grid step of the packed-sequence LSTM."""
    Bb, Hp = h_out_ref.shape                       # rows per batch block, hidden
    Tc = x_ref.shape[0] // Bb                      # timesteps in this chunk
    t_chunk = pl.program_id(1)

    @pl.when(t_chunk == 0)
    def _():                                       # fresh sequence for this batch block
        h_scr[...] = jnp.zeros_like(h_scr)
        c_scr[...] = jnp.zeros_like(c_scr)

    # ---- Stage 1: input projection for the whole chunk, ONE MXU GEMM. ----
    # [Tc*Bb, E] bf16  x  [E, 4H] bf16  ->  [Tc*Bb, 4H] f32, bias broadcast ONCE.
    xg_scr[...] = (jnp.dot(x_ref[...], wih_ref[...],
                           preferred_element_type=jnp.float32) + b_ref[...])

    lengths = len_ref[...]                         # [Bb, 1] int32 (hoisted, invariant)
    t_base = t_chunk * Tc

    # ---- Stage 2: recurrence; h/c carried as values inside the chunk. ----
    # Whh is re-read from VMEM each step (vld slots are idle) instead of pinning
    # 32 vregs across the unrolled loop.
    def step(t, carry):
        h, c = carry
        row = pl.multiple_of(t * Bb, 8)            # sublane-aligned dynamic slice
        gates = (xg_scr[pl.ds(row, Bb), :]
                 + jnp.dot(h.astype(jnp.bfloat16), whh_ref[...],
                           preferred_element_type=jnp.float32))
        i_g = _sigmoid(gates[:, 0 * Hp:1 * Hp])
        f_g = _sigmoid(gates[:, 1 * Hp:2 * Hp])
        g_g = jnp.tanh(gates[:, 2 * Hp:3 * Hp])
        o_g = _sigmoid(gates[:, 3 * Hp:4 * Hp])
        c_new = f_g * c + i_g * g_g
        h_new = o_g * jnp.tanh(c_new)
        # pack_padded_sequence semantics: state freezes once t >= length[b].
        mask = (t_base + t) < lengths              # [Bb, 1] -> broadcast over lanes
        return jnp.where(mask, h_new, h), jnp.where(mask, c_new, c)

    h1, c1 = lax.fori_loop(0, Tc, step, (h_scr[...], c_scr[...]), unroll=unroll)
    h_scr[...] = h1                                # carry to the next time chunk
    c_scr[...] = c1

    @pl.when(t_chunk == pl.num_programs(1) - 1)
    def _():
        h_out_ref[...] = h1                        # lane-dense [Bb, 128k] store


def lstm_last_hidden(padded_idx, lengths, emb_matrix, w_ih, w_hh, b_ih, b_hh,
                     *, time_chunk=64, batch_block=None):
    """hn[-1] of nn.LSTM over pack_padded_sequence(embeds, lengths), batch_first."""
    B, T = padded_idx.shape
    H = w_hh.shape[1]
    V, E = emb_matrix.shape
    assert H % 128 == 0, "hidden_size must be a lane multiple"
    # TODO(synk): general (non-multiple-of-128) H would need gate-wise padding of
    #             w_ih/w_hh/biases in this wrapper.

    # ---- pad to hardware-friendly shapes ------------------------------------
    Ep = _round_up(max(E, 128), 128)               # lane-align contraction dim (zeros)
    if batch_block is None:
        batch_block = min(64, _round_up(B, 8))
    Bb = _round_up(batch_block, 8)                 # rows per batch block (sublanes)
    Bp = _round_up(max(B, Bb), Bb)
    nb = Bp // Bb
    Tc = max(1, min(time_chunk, T))                # timesteps per chunk
    Tp = _round_up(T, Tc)
    nt = Tp // Tc

    idx_p = jnp.pad(padded_idx.astype(jnp.int32), ((0, Bp - B), (0, Tp - T)))
    len_p = jnp.pad(lengths.astype(jnp.int32), (0, Bp - B))[:, None]       # [Bp, 1]

    # Frozen embedding (padding_idx=0), gathered directly in the kernel's
    # [batch_block, time*rows_in_block, E] layout, already in bf16 (MXU operand).
    emb_bf16 = jnp.pad(jnp.asarray(emb_matrix, jnp.float32),
                       ((0, 0), (0, Ep - E))).astype(jnp.bfloat16)
    idx_blk = idx_p.reshape(nb, Bb, Tp).transpose(0, 2, 1)                 # [nb,Tp,Bb]
    x = jnp.take(emb_bf16, idx_blk, axis=0).reshape(nb, Tp * Bb, Ep)       # bf16

    wih_t = jnp.pad(jnp.asarray(w_ih, jnp.float32),
                    ((0, 0), (0, Ep - E))).T.astype(jnp.bfloat16)          # [Ep, 4H]
    whh_t = jnp.asarray(w_hh, jnp.float32).T.astype(jnp.bfloat16)          # [H, 4H]
    bias = (jnp.asarray(b_ih, jnp.float32)
            + jnp.asarray(b_hh, jnp.float32))[None, :]                     # [1, 4H]

    # ---- VMEM budget & cost estimate ----------------------------------------
    vmem_bytes = (2 * Tc * Bb * Ep * 2                      # x chunk, double-buffered
                  + Tc * Bb * 4 * H * 4                     # xg scratch (f32)
                  + 2 * (Ep * 4 * H + H * 4 * H) * 2        # weights (double-buffered)
                  + 2 * 4 * H * 4                           # bias
                  + 2 * Bb * H * 4                          # h/c carry scratch
                  + 2 * Bb * H * 4                          # output block
                  + 2 * 8 * 128 * 4)                        # lengths tile
    vmem_limit = int(min(64 << 20, max(16 << 20, 2 * vmem_bytes)))
    flops = 2 * Tp * Bp * Ep * 4 * H + 2 * Tp * Bp * H * 4 * H
    transcendentals = 5 * Tp * Bp * H
    bytes_accessed = int(x.size * 2 + wih_t.size * 2 + whh_t.size * 2
                         + bias.size * 4 + len_p.size * 4 + Bp * H * 4)

    unroll = int(max(1, min(Tc, 8)))               # bounded unroll: no code-size blowup
    h_final = pl.pallas_call(
        functools.partial(lstm_chunk_kernel, unroll=unroll),
        out_shape=jax.ShapeDtypeStruct((Bp, H), jnp.float32),
        grid_spec=pltpu.PrefetchScalarGridSpec(
            num_scalar_prefetch=0,
            grid=(nb, nt),                         # (batch blocks, time chunks)
            in_specs=[
                pl.BlockSpec((Bb, 1), lambda b, t: (b, 0)),                 # lengths
                pl.BlockSpec((None, Tc * Bb, Ep), lambda b, t: (b, t, 0)),  # x chunk
                pl.BlockSpec((Ep, 4 * H), lambda b, t: (0, 0)),             # Wih^T
                pl.BlockSpec((H, 4 * H), lambda b, t: (0, 0)),              # Whh^T
                pl.BlockSpec((1, 4 * H), lambda b, t: (0, 0)),              # bias
            ],
            out_specs=pl.BlockSpec((Bb, H), lambda b, t: (b, 0)),
            scratch_shapes=[
                pltpu.VMEM((Tc * Bb, 4 * H), jnp.float32),  # chunk input projection
                pltpu.VMEM((Bb, H), jnp.float32),           # h carry across chunks
                pltpu.VMEM((Bb, H), jnp.float32),           # c carry across chunks
            ]),
        compiler_params=pltpu.CompilerParams(
            dimension_semantics=("parallel", "arbitrary"),
            vmem_limit_bytes=vmem_limit),
        cost_estimate=pl.CostEstimate(flops=flops,
                                      transcendentals=transcendentals,
                                      bytes_accessed=bytes_accessed),
    )(len_p, x, wih_t, whh_t, bias)

    return h_final[:B]


def siamese_lstm_forward(idx_q1, len_q1, idx_q2, len_q2, emb_matrix,
                         w_ih, w_hh, b_ih, b_hh, **kw):
    """Both Siamese towers through ONE LSTM kernel call (doubles recurrent-GEMM M)."""
    B1, T1 = idx_q1.shape
    B2, T2 = idx_q2.shape
    T = max(T1, T2)
    idx = jnp.concatenate([jnp.pad(idx_q1, ((0, 0), (0, T - T1))),
                           jnp.pad(idx_q2, ((0, 0), (0, T - T2)))], axis=0)
    lens = jnp.concatenate([len_q1, len_q2], axis=0)
    h = lstm_last_hidden(idx, lens, emb_matrix, w_ih, w_hh, b_ih, b_hh, **kw)
    # TODO(synk): nn.Dropout(0.3) at train time would need pltpu.prng_*; eval = identity.
    return h[:B1], h[B1:B1 + B2]


def lstm_ref(padded_idx, lengths, emb_matrix, w_ih, w_hh, b_ih, b_hh):
    """Pure-JAX lax.scan reference (same bf16 matmul operands, exact sigmoid)."""
    x = jnp.take(emb_matrix, padded_idx, axis=0).astype(jnp.bfloat16)      # [B, T, E]
    B, T, _ = x.shape
    H = w_hh.shape[1]
    wih = jnp.asarray(w_ih, jnp.float32).T.astype(jnp.bfloat16)            # [E, 4H]
    whh = jnp.asarray(w_hh, jnp.float32).T.astype(jnp.bfloat16)            # [H, 4H]
    bias = (jnp.asarray(b_ih, jnp.float32) + jnp.asarray(b_hh, jnp.float32))[None, :]

    def step(carry, inp):
        h, c = carry
        x_t, t = inp
        gates = (jnp.dot(x_t, wih, preferred_element_type=jnp.float32)
                 + jnp.dot(h.astype(jnp.bfloat16), whh,
                           preferred_element_type=jnp.float32)
                 + bias)
        i = jax.nn.sigmoid(gates[:, :H])
        f = jax.nn.sigmoid(gates[:, H:2 * H])
        g = jnp.tanh(gates[:, 2 * H:3 * H])
        o = jax.nn.sigmoid(gates[:, 3 * H:])
        c_new = f * c + i * g
        h_new = o * jnp.tanh(c_new)
        mask = (t < lengths)[:, None]
        return (jnp.where(mask, h_new, h), jnp.where(mask, c_new, c)), None

    h0 = jnp.zeros((B, H), jnp.float32)
    c0 = jnp.zeros((B, H), jnp.float32)
    (h, _), _ = lax.scan(step, (h0, c0),
                         (jnp.transpose(x, (1, 0, 2)), jnp.arange(T)))
    return h


if __name__ == "__main__":
    # Small, deterministic configuration (H matches the module default hidden_size).
    B, T = 2, 8            # texts per Siamese tower, max sequence length after padding
    V, E = 64, 128         # vocab size, embedding dim (lane-aligned)
    H = 128                # hidden size (gate slices land on whole 128-lane vregs)

    key = jax.random.PRNGKey(0)
    k_emb, k_i1, k_i2, k_wih, k_whh, k_bih, k_bhh = jax.random.split(key, 7)

    # Frozen embedding matrix; row 0 is the padding embedding (padding_idx=0).
    emb_matrix = jax.random.normal(k_emb, (V, E), dtype=jnp.float32)
    emb_matrix = emb_matrix.at[0].set(0.0)

    # Two synthetic "tokenized + padded" text batches (the two Siamese towers).
    len_q1 = jnp.array([8, 5], dtype=jnp.int32)
    len_q2 = jnp.array([6, 3], dtype=jnp.int32)
    pos = jnp.arange(T)[None, :]
    idx_q1 = jnp.where(pos < len_q1[:, None],
                       jax.random.randint(k_i1, (B, T), 1, V, dtype=jnp.int32), 0)
    idx_q2 = jnp.where(pos < len_q2[:, None],
                       jax.random.randint(k_i2, (B, T), 1, V, dtype=jnp.int32), 0)

    # Deterministic LSTM parameters (PyTorch shapes: [4H, E], [4H, H], [4H]).
    scale = 1.0 / np.sqrt(H)
    w_ih = jax.random.uniform(k_wih, (4 * H, E), jnp.float32, -scale, scale)
    w_hh = jax.random.uniform(k_whh, (4 * H, H), jnp.float32, -scale, scale)
    b_ih = jax.random.uniform(k_bih, (4 * H,), jnp.float32, -scale, scale)
    b_hh = jax.random.uniform(k_bhh, (4 * H,), jnp.float32, -scale, scale)

    # time_chunk=4 so the T-chunked grid (nt=2) and the h/c scratch carry are exercised.
    h1, h2 = siamese_lstm_forward(idx_q1, len_q1, idx_q2, len_q2, emb_matrix,
                                  w_ih, w_hh, b_ih, b_hh, time_chunk=4)
    h1, h2 = jax.block_until_ready((h1, h2))

    r1 = lstm_ref(idx_q1, len_q1, emb_matrix, w_ih, w_hh, b_ih, b_hh)
    r2 = lstm_ref(idx_q2, len_q2, emb_matrix, w_ih, w_hh, b_ih, b_hh)
    np.testing.assert_allclose(np.asarray(h1), np.asarray(r1), rtol=5e-3, atol=5e-3)
    np.testing.assert_allclose(np.asarray(h2), np.asarray(r2), rtol=5e-3, atol=5e-3)
    print("KERNEL_OK")
</pallas_src>

<mosaic_0001>
module attributes {stable_mosaic.version = 11 : i64} {
  func.func @lstm_chunk_kernel(%arg0: i32, %arg1: i32, %arg2: memref<8x1xi32, #tpu.memory_space<vmem>>, %arg3: memref<1x32x128xbf16, #tpu.memory_space<vmem>>, %arg4: memref<128x512xbf16, #tpu.memory_space<vmem>>, %arg5: memref<128x512xbf16, #tpu.memory_space<vmem>>, %arg6: memref<1x512xf32, #tpu.memory_space<vmem>>, %arg7: memref<8x128xf32, #tpu.memory_space<vmem>>, %arg8: memref<32x512xf32, #tpu.memory_space<vmem>>, %arg9: memref<8x128xf32, #tpu.memory_space<vmem>>, %arg10: memref<8x128xf32, #tpu.memory_space<vmem>>) attributes {dimension_semantics = [#tpu.dimension_semantics<parallel>, #tpu.dimension_semantics<arbitrary>], iteration_bounds = array<i64: 1, 2>, scalar_prefetch = 0 : i64, scratch_operands = 3 : i64, tpu.core_type = #tpu.core_type<tc>, window_params = [{transform_indices = @transform_0, window_bounds = array<i64: 8, 1>}, {transform_indices = @transform_1, window_bounds = array<i64: 1, 32, 128>}, {pipeline_mode = #tpu.pipeline_mode<synchronous>, transform_indices = @transform_2, window_bounds = array<i64: 128, 512>}, {pipeline_mode = #tpu.pipeline_mode<synchronous>, transform_indices = @transform_3, window_bounds = array<i64: 128, 512>}, {pipeline_mode = #tpu.pipeline_mode<synchronous>, transform_indices = @transform_4, window_bounds = array<i64: 1, 512>}, {transform_indices = @transform_5, window_bounds = array<i64: 8, 128>}]} {
    %c0_i32 = arith.constant 0 : i32
    %0 = arith.cmpi eq, %arg1, %c0_i32 : i32
    %1 = arith.extui %0 : i1 to i32
    %c0_i32_0 = arith.constant 0 : i32
    %2 = arith.cmpi ne, %1, %c0_i32_0 : i32
    scf.if %2 {
      %cst_78 = arith.constant 0.000000e+00 : f32
      %212 = vector.broadcast %cst_78 : f32 to vector<8x128xf32>
      %c0_79 = arith.constant 0 : index
      %c0_80 = arith.constant 0 : index
      %213 = vector.load %arg9[%c0_79, %c0_80] : memref<8x128xf32, #tpu.memory_space<vmem>>, vector<8x128xf32>
      tpu.vector_store %arg9[%c0_79, %c0_80], %212 {strides = array<i32>} : memref<8x128xf32, #tpu.memory_space<vmem>>, vector<8x128xf32>,
      %cst_81 = arith.constant 0.000000e+00 : f32
      %214 = vector.broadcast %cst_81 : f32 to vector<8x128xf32>
      %c0_82 = arith.constant 0 : index
      %c0_83 = arith.constant 0 : index
      %215 = vector.load %arg10[%c0_82, %c0_83] : memref<8x128xf32, #tpu.memory_space<vmem>>, vector<8x128xf32>
      tpu.vector_store %arg10[%c0_82, %c0_83], %214 {strides = array<i32>} : memref<8x128xf32, #tpu.memory_space<vmem>>, vector<8x128xf32>,
    } else {
    }
    %c0 = arith.constant 0 : index
    %c0_1 = arith.constant 0 : index
    %c0_2 = arith.constant 0 : index
    %3 = vector.load %arg3[%c0, %c0_1, %c0_2] : memref<1x32x128xbf16, #tpu.memory_space<vmem>>, vector<1x32x128xbf16>
    %4 = vector.shape_cast %3 : vector<1x32x128xbf16> to vector<32x128xbf16>
    %c0_3 = arith.constant 0 : index
    %c0_4 = arith.constant 0 : index
    %5 = vector.load %arg4[%c0_3, %c0_4] : memref<128x512xbf16, #tpu.memory_space<vmem>>, vector<128x512xbf16>
    %cst = arith.constant dense<0.000000e+00> : vector<32x512xf32>
    %6 = tpu.matmul %4, %5, %cst {dimension_numbers = #tpu.dot_dimension_numbers<[1], [0], [0], [1], [0, 0, 1, 1], [], []>} : vector<32x128xbf16>, vector<128x512xbf16>, vector<32x512xf32> -> vector<32x512xf32>
    %c0_5 = arith.constant 0 : index
    %c0_6 = arith.constant 0 : index
    %7 = vector.load %arg6[%c0_5, %c0_6] : memref<1x512xf32, #tpu.memory_space<vmem>>, vector<1x512xf32>
    %8 = vector.broadcast %7 : vector<1x512xf32> to vector<32x512xf32>
    %9 = arith.addf %6, %8 : vector<32x512xf32>
    %c0_7 = arith.constant 0 : index
    %c0_8 = arith.constant 0 : index
    %10 = vector.load %arg8[%c0_7, %c0_8] : memref<32x512xf32, #tpu.memory_space<vmem>>, vector<32x512xf32>
    tpu.vector_store %arg8[%c0_7, %c0_8], %9 {strides = array<i32>} : memref<32x512xf32, #tpu.memory_space<vmem>>, vector<32x512xf32>,
    %c0_9 = arith.constant 0 : index
    %c0_10 = arith.constant 0 : index
    %11 = vector.load %arg2[%c0_9, %c0_10] : memref<8x1xi32, #tpu.memory_space<vmem>>, vector<8x1xi32>
    %c4_i32 = arith.constant 4 : i32
    %12 = arith.muli %arg1, %c4_i32 : i32
    %c0_11 = arith.constant 0 : index
    %c0_12 = arith.constant 0 : index
    %13 = vector.load %arg9[%c0_11, %c0_12] : memref<8x128xf32, #tpu.memory_space<vmem>>, vector<8x128xf32>
    %c0_13 = arith.constant 0 : index
    %c0_14 = arith.constant 0 : index
    %14 = vector.load %arg10[%c0_13, %c0_14] : memref<8x128xf32, #tpu.memory_space<vmem>>, vector<8x128xf32>
    %c0_i32_15 = arith.constant 0 : i32
    %c8_i32 = arith.constant 8 : i32
    %15 = arith.muli %c0_i32_15, %c8_i32 : i32
    %16 = tpu.assume_multiple %15, 8 : i32
    %17 = arith.index_cast %16 : i32 to index
    %c0_16 = arith.constant 0 : index
    %18 = vector.load %arg8[%17, %c0_16] : memref<32x512xf32, #tpu.memory_space<vmem>>, vector<8x512xf32>
    %19 = arith.truncf %13 : vector<8x128xf32> to vector<8x128xbf16>
    %c0_17 = arith.constant 0 : index
    %c0_18 = arith.constant 0 : index
    %20 = vector.load %arg5[%c0_17, %c0_18] : memref<128x512xbf16, #tpu.memory_space<vmem>>, vector<128x512xbf16>
    %cst_19 = arith.constant dense<0.000000e+00> : vector<8x512xf32>
    %21 = tpu.matmul %19, %20, %cst_19 {dimension_numbers = #tpu.dot_dimension_numbers<[1], [0], [0], [1], [0, 0, 1, 1], [], []>} : vector<8x128xbf16>, vector<128x512xbf16>, vector<8x512xf32> -> vector<8x512xf32>
    %22 = arith.addf %18, %21 : vector<8x512xf32>
    %23 = vector.extract_strided_slice %22 {offsets = [0, 0], sizes = [8, 128], strides = [1, 1]} : vector<8x512xf32> to vector<8x128xf32>
    %cst_20 = arith.constant 5.000000e-01 : f32
    %24 = vector.broadcast %cst_20 : f32 to vector<8x128xf32>
    %25 = arith.mulf %24, %23 : vector<8x128xf32>
    %26 = math.tanh %25 : vector<8x128xf32>
    %cst_21 = arith.constant 5.000000e-01 : f32
    %27 = vector.broadcast %cst_21 : f32 to vector<8x128xf32>
    %28 = arith.mulf %27, %26 : vector<8x128xf32>
    %cst_22 = arith.constant 5.000000e-01 : f32
    %29 = vector.broadcast %cst_22 : f32 to vector<8x128xf32>
    %30 = arith.addf %28, %29 : vector<8x128xf32>
    %31 = vector.extract_strided_slice %22 {offsets = [0, 128], sizes = [8, 128], strides = [1, 1]} : vector<8x512xf32> to vector<8x128xf32>
    %cst_23 = arith.constant 5.000000e-01 : f32
    %32 = vector.broadcast %cst_23 : f32 to vector<8x128xf32>
    %33 = arith.mulf %32, %31 : vector<8x128xf32>
    %34 = math.tanh %33 : vector<8x128xf32>
    %cst_24 = arith.constant 5.000000e-01 : f32
    %35 = vector.broadcast %cst_24 : f32 to vector<8x128xf32>
    %36 = arith.mulf %35, %34 : vector<8x128xf32>
    %cst_25 = arith.constant 5.000000e-01 : f32
    %37 = vector.broadcast %cst_25 : f32 to vector<8x128xf32>
    %38 = arith.addf %36, %37 : vector<8x128xf32>
    %39 = vector.extract_strided_slice %22 {offsets = [0, 256], sizes = [8, 128], strides = [1, 1]} : vector<8x512xf32> to vector<8x128xf32>
    %40 = math.tanh %39 : vector<8x128xf32>
    %41 = vector.extract_strided_slice %22 {offsets = [0, 384], sizes = [8, 128], strides = [1, 1]} : vector<8x512xf32> to vector<8x128xf32>
    %cst_26 = arith.constant 5.000000e-01 : f32
    %42 = vector.broadcast %cst_26 : f32 to vector<8x128xf32>
    %43 = arith.mulf %42, %41 : vector<8x128xf32>
    %44 = math.tanh %43 : vector<8x128xf32>
    %cst_27 = arith.constant 5.000000e-01 : f32
    %45 = vector.broadcast %cst_27 : f32 to vector<8x128xf32>
    %46 = arith.mulf %45, %44 : vector<8x128xf32>
    %cst_28 = arith.constant 5.000000e-01 : f32
    %47 = vector.broadcast %cst_28 : f32 to vector<8x128xf32>
    %48 = arith.addf %46, %47 : vector<8x128xf32>
    %49 = arith.mulf %38, %14 : vector<8x128xf32>
    %50 = arith.mulf %30, %40 : vector<8x128xf32>
    %51 = arith.addf %49, %50 : vector<8x128xf32>
    %52 = math.tanh %51 : vector<8x128xf32>
    %53 = arith.mulf %48, %52 : vector<8x128xf32>
    %54 = arith.addi %12, %c0_i32_15 : i32
    %55 = vector.broadcast %54 : i32 to vector<8x1xi32>
    %56 = arith.cmpi slt, %55, %11 : vector<8x1xi32>
    %57 = vector.shape_cast %56 : vector<8x1xi1> to vector<8x1xi1>
    %58 = vector.broadcast %57 : vector<8x1xi1> to vector<8x128xi1>
    %59 = arith.select %58, %53, %13 : vector<8x128xi1>, vector<8x128xf32>
    %60 = vector.shape_cast %56 : vector<8x1xi1> to vector<8x1xi1>
    %61 = vector.broadcast %60 : vector<8x1xi1> to vector<8x128xi1>
    %62 = arith.select %61, %51, %14 : vector<8x128xi1>, vector<8x128xf32>
    %c1_i32 = arith.constant 1 : i32
    %c8_i32_29 = arith.constant 8 : i32
    %63 = arith.muli %c1_i32, %c8_i32_29 : i32
    %64 = tpu.assume_multiple %63, 8 : i32
    %65 = arith.index_cast %64 : i32 to index
    %c0_30 = arith.constant 0 : index
    %66 = vector.load %arg8[%65, %c0_30] : memref<32x512xf32, #tpu.memory_space<vmem>>, vector<8x512xf32>
    %67 = arith.truncf %59 : vector<8x128xf32> to vector<8x128xbf16>
    %c0_31 = arith.constant 0 : index
    %c0_32 = arith.constant 0 : index
    %68 = vector.load %arg5[%c0_31, %c0_32] : memref<128x512xbf16, #tpu.memory_space<vmem>>, vector<128x512xbf16>
    %cst_33 = arith.constant dense<0.000000e+00> : vector<8x512xf32>
    %69 = tpu.matmul %67, %68, %cst_33 {dimension_numbers = #tpu.dot_dimension_numbers<[1], [0], [0], [1], [0, 0, 1, 1], [], []>} : vector<8x128xbf16>, vector<128x512xbf16>, vector<8x512xf32> -> vector<8x512xf32>
    %70 = arith.addf %66, %69 : vector<8x512xf32>
    %71 = vector.extract_strided_slice %70 {offsets = [0, 0], sizes = [8, 128], strides = [1, 1]} : vector<8x512xf32> to vector<8x128xf32>
    %cst_34 = arith.constant 5.000000e-01 : f32
    %72 = vector.broadcast %cst_34 : f32 to vector<8x128xf32>
    %73 = arith.mulf %72, %71 : vector<8x128xf32>
    %74 = math.tanh %73 : vector<8x128xf32>
    %cst_35 = arith.constant 5.000000e-01 : f32
    %75 = vector.broadcast %cst_35 : f32 to vector<8x128xf32>
    %76 = arith.mulf %75, %74 : vector<8x128xf32>
    %cst_36 = arith.constant 5.000000e-01 : f32
    %77 = vector.broadcast %cst_36 : f32 to vector<8x128xf32>
    %78 = arith.addf %76, %77 : vector<8x128xf32>
    %79 = vector.extract_strided_slice %70 {offsets = [0, 128], sizes = [8, 128], strides = [1, 1]} : vector<8x512xf32> to vector<8x128xf32>
    %cst_37 = arith.constant 5.000000e-01 : f32
    %80 = vector.broadcast %cst_37 : f32 to vector<8x128xf32>
    %81 = arith.mulf %80, %79 : vector<8x128xf32>
    %82 = math.tanh %81 : vector<8x128xf32>
    %cst_38 = arith.constant 5.000000e-01 : f32
    %83 = vector.broadcast %cst_38 : f32 to vector<8x128xf32>
    %84 = arith.mulf %83, %82 : vector<8x128xf32>
    %cst_39 = arith.constant 5.000000e-01 : f32
    %85 = vector.broadcast %cst_39 : f32 to vector<8x128xf32>
    %86 = arith.addf %84, %85 : vector<8x128xf32>
    %87 = vector.extract_strided_slice %70 {offsets = [0, 256], sizes = [8, 128], strides = [1, 1]} : vector<8x512xf32> to vector<8x128xf32>
    %88 = math.tanh %87 : vector<8x128xf32>
    %89 = vector.extract_strided_slice %70 {offsets = [0, 384], sizes = [8, 128], strides = [1, 1]} : vector<8x512xf32> to vector<8x128xf32>
    %cst_40 = arith.constant 5.000000e-01 : f32
    %90 = vector.broadcast %cst_40 : f32 to vector<8x128xf32>
    %91 = arith.mulf %90, %89 : vector<8x128xf32>
    %92 = math.tanh %91 : vector<8x128xf32>
    %cst_41 = arith.constant 5.000000e-01 : f32
    %93 = vector.broadcast %cst_41 : f32 to vector<8x128xf32>
    %94 = arith.mulf %93, %92 : vector<8x128xf32>
    %cst_42 = arith.constant 5.000000e-01 : f32
    %95 = vector.broadcast %cst_42 : f32 to vector<8x128xf32>
    %96 = arith.addf %94, %95 : vector<8x128xf32>
    %97 = arith.mulf %86, %62 : vector<8x128xf32>
    %98 = arith.mulf %78, %88 : vector<8x128xf32>
    %99 = arith.addf %97, %98 : vector<8x128xf32>
    %100 = math.tanh %99 : vector<8x128xf32>
    %101 = arith.mulf %96, %100 : vector<8x128xf32>
    %102 = arith.addi %12, %c1_i32 : i32
    %103 = vector.broadcast %102 : i32 to vector<8x1xi32>
    %104 = arith.cmpi slt, %103, %11 : vector<8x1xi32>
    %105 = vector.shape_cast %104 : vector<8x1xi1> to vector<8x1xi1>
    %106 = vector.broadcast %105 : vector<8x1xi1> to vector<8x128xi1>
    %107 = arith.select %106, %101, %59 : vector<8x128xi1>, vector<8x128xf32>
    %108 = vector.shape_cast %104 : vector<8x1xi1> to vector<8x1xi1>
    %109 = vector.broadcast %108 : vector<8x1xi1> to vector<8x128xi1>
    %110 = arith.select %109, %99, %62 : vector<8x128xi1>, vector<8x128xf32>
    %c2_i32 = arith.constant 2 : i32
    %c8_i32_43 = arith.constant 8 : i32
    %111 = arith.muli %c2_i32, %c8_i32_43 : i32
    %112 = tpu.assume_multiple %111, 8 : i32
    %113 = arith.index_cast %112 : i32 to index
    %c0_44 = arith.constant 0 : index
    %114 = vector.load %arg8[%113, %c0_44] : memref<32x512xf32, #tpu.memory_space<vmem>>, vector<8x512xf32>
    %115 = arith.truncf %107 : vector<8x128xf32> to vector<8x128xbf16>
    %c0_45 = arith.constant 0 : index
    %c0_46 = arith.constant 0 : index
    %116 = vector.load %arg5[%c0_45, %c0_46] : memref<128x512xbf16, #tpu.memory_space<vmem>>, vector<128x512xbf16>
    %cst_47 = arith.constant dense<0.000000e+00> : vector<8x512xf32>
    %117 = tpu.matmul %115, %116, %cst_47 {dimension_numbers = #tpu.dot_dimension_numbers<[1], [0], [0], [1], [0, 0, 1, 1], [], []>} : vector<8x128xbf16>, vector<128x512xbf16>, vector<8x512xf32> -> vector<8x512xf32>
    %118 = arith.addf %114, %117 : vector<8x512xf32>
    %119 = vector.extract_strided_slice %118 {offsets = [0, 0], sizes = [8, 128], strides = [1, 1]} : vector<8x512xf32> to vector<8x128xf32>
    %cst_48 = arith.constant 5.000000e-01 : f32
    %120 = vector.broadcast %cst_48 : f32 to vector<8x128xf32>
    %121 = arith.mulf %120, %119 : vector<8x128xf32>
    %122 = math.tanh %121 : vector<8x128xf32>
    %cst_49 = arith.constant 5.000000e-01 : f32
    %123 = vector.broadcast %cst_49 : f32 to vector<8x128xf32>
    %124 = arith.mulf %123, %122 : vector<8x128xf32>
    %cst_50 = arith.constant 5.000000e-01 : f32
    %125 = vector.broadcast %cst_50 : f32 to vector<8x128xf32>
    %126 = arith.addf %124, %125 : vector<8x128xf32>
    %127 = vector.extract_strided_slice %118 {offsets = [0, 128], sizes = [8, 128], strides = [1, 1]} : vector<8x512xf32> to vector<8x128xf32>
    %cst_51 = arith.constant 5.000000e-01 : f32
    %128 = vector.broadcast %cst_51 : f32 to vector<8x128xf32>
    %129 = arith.mulf %128, %127 : vector<8x128xf32>
    %130 = math.tanh %129 : vector<8x128xf32>
    %cst_52 = arith.constant 5.000000e-01 : f32
    %131 = vector.broadcast %cst_52 : f32 to vector<8x128xf32>
    %132 = arith.mulf %131, %130 : vector<8x128xf32>
    %cst_53 = arith.constant 5.000000e-01 : f32
    %133 = vector.broadcast %cst_53 : f32 to vector<8x128xf32>
    %134 = arith.addf %132, %133 : vector<8x128xf32>
    %135 = vector.extract_strided_slice %118 {offsets = [0, 256], sizes = [8, 128], strides = [1, 1]} : vector<8x512xf32> to vector<8x128xf32>
    %136 = math.tanh %135 : vector<8x128xf32>
    %137 = vector.extract_strided_slice %118 {offsets = [0, 384], sizes = [8, 128], strides = [1, 1]} : vector<8x512xf32> to vector<8x128xf32>
    %cst_54 = arith.constant 5.000000e-01 : f32
    %138 = vector.broadcast %cst_54 : f32 to vector<8x128xf32>
    %139 = arith.mulf %138, %137 : vector<8x128xf32>
    %140 = math.tanh %139 : vector<8x128xf32>
    %cst_55 = arith.constant 5.000000e-01 : f32
    %141 = vector.broadcast %cst_55 : f32 to vector<8x128xf32>
    %142 = arith.mulf %141, %140 : vector<8x128xf32>
    %cst_56 = arith.constant 5.000000e-01 : f32
    %143 = vector.broadcast %cst_56 : f32 to vector<8x128xf32>
    %144 = arith.addf %142, %143 : vector<8x128xf32>
    %145 = arith.mulf %134, %110 : vector<8x128xf32>
    %146 = arith.mulf %126, %136 : vector<8x128xf32>
    %147 = arith.addf %145, %146 : vector<8x128xf32>
    %148 = math.tanh %147 : vector<8x128xf32>
    %149 = arith.mulf %144, %148 : vector<8x128xf32>
    %150 = arith.addi %12, %c2_i32 : i32
    %151 = vector.broadcast %150 : i32 to vector<8x1xi32>
    %152 = arith.cmpi slt, %151, %11 : vector<8x1xi32>
    %153 = vector.shape_cast %152 : vector<8x1xi1> to vector<8x1xi1>
    %154 = vector.broadcast %153 : vector<8x1xi1> to vector<8x128xi1>
    %155 = arith.select %154, %149, %107 : vector<8x128xi1>, vector<8x128xf32>
    %156 = vector.shape_cast %152 : vector<8x1xi1> to vector<8x1xi1>
    %157 = vector.broadcast %156 : vector<8x1xi1> to vector<8x128xi1>
    %158 = arith.select %157, %147, %110 : vector<8x128xi1>, vector<8x128xf32>
    %c3_i32 = arith.constant 3 : i32
    %c8_i32_57 = arith.constant 8 : i32
    %159 = arith.muli %c3_i32, %c8_i32_57 : i32
    %160 = tpu.assume_multiple %159, 8 : i32
    %161 = arith.index_cast %160 : i32 to index
    %c0_58 = arith.constant 0 : index
    %162 = vector.load %arg8[%161, %c0_58] : memref<32x512xf32, #tpu.memory_space<vmem>>, vector<8x512xf32>
    %163 = arith.truncf %155 : vector<8x128xf32> to vector<8x128xbf16>
    %c0_59 = arith.constant 0 : index
    %c0_60 = arith.constant 0 : index
    %164 = vector.load %arg5[%c0_59, %c0_60] : memref<128x512xbf16, #tpu.memory_space<vmem>>, vector<128x512xbf16>
    %cst_61 = arith.constant dense<0.000000e+00> : vector<8x512xf32>
    %165 = tpu.matmul %163, %164, %cst_61 {dimension_numbers = #tpu.dot_dimension_numbers<[1], [0], [0], [1], [0, 0, 1, 1], [], []>} : vector<8x128xbf16>, vector<128x512xbf16>, vector<8x512xf32> -> vector<8x512xf32>
    %166 = arith.addf %162, %165 : vector<8x512xf32>
    %167 = vector.extract_strided_slice %166 {offsets = [0, 0], sizes = [8, 128], strides = [1, 1]} : vector<8x512xf32> to vector<8x128xf32>
    %cst_62 = arith.constant 5.000000e-01 : f32
    %168 = vector.broadcast %cst_62 : f32 to vector<8x128xf32>
    %169 = arith.mulf %168, %167 : vector<8x128xf32>
    %170 = math.tanh %169 : vector<8x128xf32>
    %cst_63 = arith.constant 5.000000e-01 : f32
    %171 = vector.broadcast %cst_63 : f32 to vector<8x128xf32>
    %172 = arith.mulf %171, %170 : vector<8x128xf32>
    %cst_64 = arith.constant 5.000000e-01 : f32
    %173 = vector.broadcast %cst_64 : f32 to vector<8x128xf32>
    %174 = arith.addf %172, %173 : vector<8x128xf32>
    %175 = vector.extract_strided_slice %166 {offsets = [0, 128], sizes = [8, 128], strides = [1, 1]} : vector<8x512xf32> to vector<8x128xf32>
    %cst_65 = arith.constant 5.000000e-01 : f32
    %176 = vector.broadcast %cst_65 : f32 to vector<8x128xf32>
    %177 = arith.mulf %176, %175 : vector<8x128xf32>
    %178 = math.tanh %177 : vector<8x128xf32>
    %cst_66 = arith.constant 5.000000e-01 : f32
    %179 = vector.broadcast %cst_66 : f32 to vector<8x128xf32>
    %180 = arith.mulf %179, %178 : vector<8x128xf32>
    %cst_67 = arith.constant 5.000000e-01 : f32
    %181 = vector.broadcast %cst_67 : f32 to vector<8x128xf32>
    %182 = arith.addf %180, %181 : vector<8x128xf32>
    %183 = vector.extract_strided_slice %166 {offsets = [0, 256], sizes = [8, 128], strides = [1, 1]} : vector<8x512xf32> to vector<8x128xf32>
    %184 = math.tanh %183 : vector<8x128xf32>
    %185 = vector.extract_strided_slice %166 {offsets = [0, 384], sizes = [8, 128], strides = [1, 1]} : vector<8x512xf32> to vector<8x128xf32>
    %cst_68 = arith.constant 5.000000e-01 : f32
    %186 = vector.broadcast %cst_68 : f32 to vector<8x128xf32>
    %187 = arith.mulf %186, %185 : vector<8x128xf32>
    %188 = math.tanh %187 : vector<8x128xf32>
    %cst_69 = arith.constant 5.000000e-01 : f32
    %189 = vector.broadcast %cst_69 : f32 to vector<8x128xf32>
    %190 = arith.mulf %189, %188 : vector<8x128xf32>
    %cst_70 = arith.constant 5.000000e-01 : f32
    %191 = vector.broadcast %cst_70 : f32 to vector<8x128xf32>
    %192 = arith.addf %190, %191 : vector<8x128xf32>
    %193 = arith.mulf %182, %158 : vector<8x128xf32>
    %194 = arith.mulf %174, %184 : vector<8x128xf32>
    %195 = arith.addf %193, %194 : vector<8x128xf32>
    %196 = math.tanh %195 : vector<8x128xf32>
    %197 = arith.mulf %192, %196 : vector<8x128xf32>
    %198 = arith.addi %12, %c3_i32 : i32
    %199 = vector.broadcast %198 : i32 to vector<8x1xi32>
    %200 = arith.cmpi slt, %199, %11 : vector<8x1xi32>
    %201 = vector.shape_cast %200 : vector<8x1xi1> to vector<8x1xi1>
    %202 = vector.broadcast %201 : vector<8x1xi1> to vector<8x128xi1>
    %203 = arith.select %202, %197, %155 : vector<8x128xi1>, vector<8x128xf32>
    %204 = vector.shape_cast %200 : vector<8x1xi1> to vector<8x1xi1>
    %205 = vector.broadcast %204 : vector<8x1xi1> to vector<8x128xi1>
    %206 = arith.select %205, %195, %158 : vector<8x128xi1>, vector<8x128xf32>
    %c4_i32_71 = arith.constant 4 : i32
    %c0_72 = arith.constant 0 : index
    %c0_73 = arith.constant 0 : index
    %207 = vector.load %arg9[%c0_72, %c0_73] : memref<8x128xf32, #tpu.memory_space<vmem>>, vector<8x128xf32>
    tpu.vector_store %arg9[%c0_72, %c0_73], %203 {strides = array<i32>} : memref<8x128xf32, #tpu.memory_space<vmem>>, vector<8x128xf32>,
    %c0_74 = arith.constant 0 : index
    %c0_75 = arith.constant 0 : index
    %208 = vector.load %arg10[%c0_74, %c0_75] : memref<8x128xf32, #tpu.memory_space<vmem>>, vector<8x128xf32>
    tpu.vector_store %arg10[%c0_74, %c0_75], %206 {strides = array<i32>} : memref<8x128xf32, #tpu.memory_space<vmem>>, vector<8x128xf32>,
    %c1_i32_76 = arith.constant 1 : i32
    %209 = arith.cmpi eq, %arg1, %c1_i32_76 : i32
    %210 = arith.extui %209 : i1 to i32
    %c0_i32_77 = arith.constant 0 : i32
    %211 = arith.cmpi ne, %210, %c0_i32_77 : i32
    scf.if %211 {
      %c0_78 = arith.constant 0 : index
      %c0_79 = arith.constant 0 : index
      %212 = vector.load %arg7[%c0_78, %c0_79] : memref<8x128xf32, #tpu.memory_space<vmem>>, vector<8x128xf32>
      tpu.vector_store %arg7[%c0_78, %c0_79], %203 {strides = array<i32>} : memref<8x128xf32, #tpu.memory_space<vmem>>, vector<8x128xf32>,
    } else {
    }
    return
  }
  func.func @transform_0(%arg0: i32, %arg1: i32) -> (i32, i32) {
    %c0_i32 = arith.constant 0 : i32
    %c0_i32_0 = arith.constant 0 : i32
    return %arg0, %c0_i32 : i32, i32
  }
  func.func @transform_1(%arg0: i32, %arg1: i32) -> (i32, i32, i32) {
    %c0_i32 = arith.constant 0 : i32
    %c0_i32_0 = arith.constant 0 : i32
    return %arg0, %arg1, %c0_i32 : i32, i32, i32
  }
  func.func @transform_2(%arg0: i32, %arg1: i32) -> (i32, i32) {
    %c0_i32 = arith.constant 0 : i32
    %c0_i32_0 = arith.constant 0 : i32
    %c0_i32_1 = arith.constant 0 : i32
    return %c0_i32, %c0_i32_0 : i32, i32
  }
  func.func @transform_3(%arg0: i32, %arg1: i32) -> (i32, i32) {
    %c0_i32 = arith.constant 0 : i32
    %c0_i32_0 = arith.constant 0 : i32
    %c0_i32_1 = arith.constant 0 : i32
    return %c0_i32, %c0_i32_0 : i32, i32
  }
  func.func @transform_4(%arg0: i32, %arg1: i32) -> (i32, i32) {
    %c0_i32 = arith.constant 0 : i32
    %c0_i32_0 = arith.constant 0 : i32
    %c0_i32_1 = arith.constant 0 : i32
    return %c0_i32, %c0_i32_0 : i32, i32
  }
  func.func @transform_5(%arg0: i32, %arg1: i32) -> (i32, i32) {
    %c0_i32 = arith.constant 0 : i32
    %c0_i32_0 = arith.constant 0 : i32
    return %arg0, %c0_i32 : i32, i32
  }
}

</mosaic_0001>

<bundles_post_ra>
// kernel: tpu_custom_call.1
= control target key start
LH: loop header
LB: loop body
LE: loop exit
PB: predicated region body
PF: predicated region fallthrough
CT: control target
= control target key end

     0   :  { %10 = vsyncpa [#allocation6], 0  ;;  %s2398_s0 = inlined_call_operand.vmem [shape: s32[8,1], index: 0, kind: input, shape index: {}]   ;;  %s2399_s1 = inlined_call_operand.hbm [shape: bf16[1,64,128], index: 1, kind: input, shape index: {}]   ;;  %s2400_s2 = inlined_call_operand.hbm [shape: bf16[128,512], index: 2, kind: input, shape index: {}]   ;;  %s2401_s3 = inlined_call_operand.hbm [shape: bf16[128,512], index: 3, kind: input, shape index: {}]   ;;  %s2402_s4 = inlined_call_operand.vmem [shape: f32[1,512], index: 4, kind: input, shape index: {}]   ;;  %s2403_s5 = inlined_call_operand.hbm [shape: f32[8,128], index: 5, kind: output, shape index: {}]  }
   0x1   :  { %12 = vsyncpa [#allocation6 + $0x1], 0 }
   0x2   :  { %13 = vsyncpa [#allocation9], 0 }
   0x3   :  { %14 = vsyncpa [#allocation7], 0  ;;  %s2002_s18 = smov 0   ;;  %s2004_s19 = smov 0  }
   0x4   :  { %s2006_s20 = smov 0   ;;  %s2008_s21 = smov 0  }
   0x5   :  { %s2010_s22 = smov 0   ;;  %s2012_s23 = smov 0  }
   0x6 LB: > { %s2404_s24 = sadd.s32 4294967295, %s1961_s23   ;;  %p80_p0 = scmp.ne.s32.totalorder %s1945_s19, %s1941_s18  ;;  %s1961_s23 = sphi %s2012_s23, %s20_s23   ;;  %s1957_s22 = sphi %s2010_s22, %s2429_s22   ;;  %s1953_s21 = sphi %s2008_s21, %s2428_s21   ;;  %s1949_s20 = sphi %s2006_s20, %s2427_s20   ;;  %s1945_s19 = sphi %s2004_s19, %s2426_s19   ;;  %s1941_s18 = sphi %s2002_s18, %s2425_s18  }
   0x7   : > { %p2034_p1 = scmp.eq.s32.totalorder %s2404_s24, 0  ;;  %p1304_p2 = scmp.ge.s32.totalorder %s1961_s23, 1 }
   0x8   : > { %p180_p3 = scmp.lt.s32.totalorder %s1961_s23, 3  ;;  %s198_s29 = sshll.u32 %s2400_s2, 4  ;;  %s199_s29 = int_to_ptr.hbm [resolvable:$true] %s198_s29 }
   0x9   : > { %p2042_p4 = por %p2034_p1, %p80_p0  ;;  %s1963_s6 = smov [#allocation8]  }
   0xa   : > { %p2049_p5 = pnand %p1304_p2, %p180_p3  ;;  %s200_s7 = sshll.u32 %s1963_s6, 4  ;;  %s201_s7 = int_to_ptr.vmem [resolvable:$true] %s200_s7 }
   0xb   : > { %s212_s10 = sshll.u32 %s2401_s3, 4  ;;  %s1964_s11 = smov 256   ;;  %s213_s10 = int_to_ptr.hbm [resolvable:$true] %s212_s10 }
   0xc   : > { %p1668_p6 = pneg %p2049_p5  ;;  %s1965_s12 = smov 16  }
   0xd   : > { %s1966_s13 = smov [#allocation10]   ;;  %s29_s15 = sadd.s32 1, %s1957_s22 }
   0xe   : > { %p1669_p7 = pnand %p1668_p6, %p2034_p1  ;;  %s214_s14 = sshll.u32 %s1966_s13, 4  ;;  %s215_s14 = int_to_ptr.vmem [resolvable:$true] %s214_s14 }
   0xf   : > { %s67_s16 = sadd.s32 1, %s1949_s20  ;;  %p30_p8 = scmp.ge.s32.totalorder %s29_s15, 2 }
  0x10   : > { %1671 = dma.hbm_to_vmem [thread:$0]  (!%p1669_p7), %s199_s29, 4096, %s201_s7, [#allocation9], %s1964_s11, %s1964_s11, %s1965_s12  }
  0x11   : > { %1674 = dma.hbm_to_vmem [thread:$0]  (!%p1669_p7), %s213_s10, 4096, %s215_s14, [#allocation9], %s1964_s11, %s1964_s11, %s1965_s12  }
  0x12   : > { %p74_p9 = scmp.ne.s32.totalorder %s1949_s20, %s1945_s19  ;;  %p75_p10 = scmp.eq.s32.totalorder %s1961_s23, 0 }
  0x13   : > { %p1681_p11 = scmp.lt.s32.totalorder %s1961_s23, 2  ;;  %s2431_s15 = smov (%p30_p8, %s29_s15), 0 }
  0x14   : > { %p2068_p12 = por %p75_p10, %p74_p9  ;;  %s231_s18 = sand.u32 1, %s1949_s20  }
  0x15   : > { %s63_s27 = ssub.s32 %s1957_s22, %s2431_s15  ;;  %s1309_s28 = sshll.u32 %s231_s18, 4 }
  0x16   : > { %p65_p13 = scmp.eq.s32.totalorder %s63_s27, 0  ;;  %s1587_s29 = sshll.u32 %s1957_s22, 4 }
  0x17   : > { %s242_s9 = scalar_lea.hbm %s2399_s1, %s1587_s29  ;;  %s235_s10 = scalar_lea.vmem [#allocation5], %s1309_s28 }
  0x18   : > { %s2077_s6 = scalar_select %p65_p13, %s1949_s20, %s67_s16  }
  0x19   : > { %s245_s11 = sshll.u32 %s235_s10, 4  ;;  %s243_s12 = sshll.u32 %s242_s9, 4  ;;  %s246_s11 = int_to_ptr.vmem [resolvable:$true] %s245_s11  ;;  %s244_s12 = int_to_ptr.hbm [resolvable:$true] %s243_s12 }
  0x1a   : > { %p1676_p0 = pnand %p1681_p11, %p2068_p12  ;;  %s232_s13 = scalar_lea.sflag [#allocation6], %s231_s18 }
  0x1b   : > { %s1967_s14 = smov 64   ;;  %s1968_s24 = smov 4  }
  0x1c   : > { %1678 = dma.hbm_to_vmem [thread:$0]  (!%p1676_p0), %s244_s12, 256, %s246_s11, %s232_s13, %s1967_s14, %s1967_s14, %s1968_s24  }
  0x1d   : > { %257 = sbr.rel (%p2049_p5) target bundleno = 755 (0x2f3), region = 40 }
  0x22   : > { %s259_s16 = sand.u32 1, %s1945_s19  }
  0x23   : > { %s2089_s27 = sshll.u32 %s259_s16, 4  ;;  %s260_s28 = scalar_lea.sflag [#allocation6], %s259_s16 }
  0x24   : > { %s263_s29 = scalar_lea.vmem [#allocation5], %s2089_s27 }
  0x25   : > { %1928 = dma.done.wait (%p2042_p4), %s260_s28, 256  }
  0x26   : > { %1930 = vsyncadd (%p2042_p4), %s260_s28, 4294967040 }
  0x27   : > { %1932 = dma.done.wait (%p2034_p1), [#allocation9], 8192  }
  0x28   : > { %1934 = vsyncadd (%p2034_p1), [#allocation9], 4294959104  ;;  %p1316_p2 = scmp.ne.s32.totalorder %s1953_s21, 0 }
  0x2a   : > { %308 = sbr.rel (%p1316_p2) target bundleno = 50 (0x32), region = 56 }
  0x2f   : > { %v1969_v0 = vmov 0.0  }
  0x30   : > { %309 = vst [vmem:[#allocation3] sm:$0xff] %v1969_v0 }
  0x31   : > { %310 = vst [vmem:[#allocation4] sm:$0xff] %v1969_v0 }
  0x32 PF: > { %v1439_v1 = vld [vmem:[#allocation8 + $0xe0] sm:$0xf]  ;;  %v1620_v2 = vld [vmem:[#allocation8 + $0xec] sm:$0xf0]  ;;  %v1618_v3 = vld [vmem:[#allocation8 + $0xe4] sm:$0xf] }
  0x33   : > { %v1440_v4 = vor.u32 %v1620_v2, %v1439_v1  ;;  %v1441_v5 = vld [vmem:[#allocation8 + $0xf0] sm:$0xf0]  ;;  %v1447_v6 = vld [vmem:[#allocation8 + $0xe8] sm:$0xf]  ;;  %v1621_v7 = vld [vmem:[#allocation8 + $0xf4] sm:$0xf0] }
  0x34   : > { %v1444_v8 = vor.u32 %v1618_v3, %v1441_v5  ;;  %v1448_v9 = vor.u32 %v1621_v7, %v1447_v6  ;;  %v1619_v10 = vld [vmem:[#allocation8 + $0xec] sm:$0xf]  ;;  %v1449_v11 = vld [vmem:[#allocation8 + $0xf8] sm:$0xf0]  ;;  %v1423_v12 = vld [vmem:[#allocation8 + $0xc0] sm:$0xf] }
  0x35   : > { %529 = vmatpush.bf16.msra.mxu0 %v1440_v4  ;;  %v1452_v13 = vor.u32 %v1619_v10, %v1449_v11  ;;  %v1616_v14 = vld [vmem:[#allocation8 + $0xcc] sm:$0xf0]  ;;  %v1614_v15 = vld [vmem:[#allocation8 + $0xc4] sm:$0xf]  ;;  %v1425_v16 = vld [vmem:[#allocation8 + $0xd0] sm:$0xf0] }
  0x36   : > { %548 = vmatpush.bf16.msra.mxu1 %v1444_v8  ;;  %567 = vmatpush.bf16.msra.mxu2 %v1448_v9  ;;  %v1424_v17 = vor.u32 %v1616_v14, %v1423_v12  ;;  %v1428_v18 = vor.u32 %v1614_v15, %v1425_v16  ;;  %v1431_v19 = vld [vmem:[#allocation8 + $0xc8] sm:$0xf]  ;;  %v1617_v20 = vld [vmem:[#allocation8 + $0xd4] sm:$0xf0]  ;;  %v1615_v21 = vld [vmem:[#allocation8 + $0xcc] sm:$0xf] }
  0x37   : > { %586 = vmatpush.bf16.msra.mxu3 %v1452_v13  ;;  %v1432_v22 = vor.u32 %v1617_v20, %v1431_v19  ;;  %v1433_v23 = vld [vmem:[#allocation8 + $0xd8] sm:$0xf0]  ;;  %v1407_v24 = vld [vmem:[#allocation8 + $0xa0] sm:$0xf]  ;;  %v1612_v25 = vld [vmem:[#allocation8 + $0xac] sm:$0xf0] }
  0x38   : > { %v1436_v26 = vor.u32 %v1615_v21, %v1433_v23  ;;  %v1610_v27 = vld [vmem:[#allocation8 + $0xa4] sm:$0xf]  ;;  %v1409_v28 = vld [vmem:[#allocation8 + $0xb0] sm:$0xf0]  ;;  %v1415_v29 = vld [vmem:[#allocation8 + $0xa8] sm:$0xf]  ;;  %v1408_v30 = vor.u32 %v1612_v25, %v1407_v24 }
  0x39   : > { %530 = vmatpush.bf16.msra.mxu0 %v1424_v17  ;;  %v1613_v31 = vld [vmem:[#allocation8 + $0xb4] sm:$0xf0]  ;;  %v1611_v32 = vld [vmem:[#allocation8 + $0xac] sm:$0xf]  ;;  %v1417_v33 = vld [vmem:[#allocation8 + $0xb8] sm:$0xf0]  ;;  %v1412_v34 = vor.u32 %v1610_v27, %v1409_v28 }
  0x3a   : > { %549 = vmatpush.bf16.msra.mxu1 %v1428_v18  ;;  %568 = vmatpush.bf16.msra.mxu2 %v1432_v22  ;;  %v1416_v35 = vor.u32 %v1613_v31, %v1415_v29  ;;  %v1391_v36 = vld [vmem:[#allocation8 + $0x80] sm:$0xf]  ;;  %v1608_v37 = vld [vmem:[#allocation8 + $0x8c] sm:$0xf0]  ;;  %v1606_v38 = vld [vmem:[#allocation8 + $0x84] sm:$0xf]  ;;  %v1420_v39 = vor.u32 %v1611_v32, %v1417_v33 }
  0x3b   : > { %587 = vmatpush.bf16.msra.mxu3 %v1436_v26  ;;  %v1393_v40 = vld [vmem:[#allocation8 + $0x90] sm:$0xf0]  ;;  %v1399_v41 = vld [vmem:[#allocation8 + $0x88] sm:$0xf]  ;;  %v1609_v42 = vld [vmem:[#allocation8 + $0x94] sm:$0xf0]  ;;  %v1392_v45 = vor.u32 %v1608_v37, %v1391_v36 }
  0x3c   : > { %v1607_v43 = vld [vmem:[#allocation8 + $0x8c] sm:$0xf]  ;;  %v1401_v44 = vld [vmem:[#allocation8 + $0x98] sm:$0xf0]  ;;  %v1396_v46 = vor.u32 %v1606_v38, %v1393_v40  ;;  %v1400_v47 = vor.u32 %v1609_v42, %v1399_v41  ;;  %v1375_v48 = vld [vmem:[#allocation8 + $0x60] sm:$0xf] }
  0x3d   : > { %531 = vmatpush.bf16.msra.mxu0 %v1408_v30  ;;  %v1604_v49 = vld [vmem:[#allocation8 + $0x6c] sm:$0xf0]  ;;  %v1602_v50 = vld [vmem:[#allocation8 + $0x64] sm:$0xf]  ;;  %v1404_v51 = vor.u32 %v1607_v43, %v1401_v44  ;;  %v1377_v52 = vld [vmem:[#allocation8 + $0x70] sm:$0xf0] }
  0x3e   : > { %550 = vmatpush.bf16.msra.mxu1 %v1412_v34  ;;  %569 = vmatpush.bf16.msra.mxu2 %v1416_v35  ;;  %v1383_v53 = vld [vmem:[#allocation8 + $0x68] sm:$0xf]  ;;  %v1605_v54 = vld [vmem:[#allocation8 + $0x74] sm:$0xf0]  ;;  %v1603_v55 = vld [vmem:[#allocation8 + $0x6c] sm:$0xf]  ;;  %v1376_v57 = vor.u32 %v1604_v49, %v1375_v48  ;;  %v1380_v58 = vor.u32 %v1602_v50, %v1377_v52 }
  0x3f   : > { %588 = vmatpush.bf16.msra.mxu3 %v1420_v39  ;;  %v1385_v56 = vld [vmem:[#allocation8 + $0x78] sm:$0xf0]  ;;  %v1384_v59 = vor.u32 %v1605_v54, %v1383_v53  ;;  %v1359_v60 = vld [vmem:[#allocation8 + $0x40] sm:$0xf]  ;;  %v1600_v61 = vld [vmem:[#allocation8 + $0x4c] sm:$0xf0] }
  0x40   : > { %v1598_v62 = vld [vmem:[#allocation8 + $0x44] sm:$0xf]  ;;  %v1388_v63 = vor.u32 %v1603_v55, %v1385_v56  ;;  %v1361_v0 = vld [vmem:[#allocation8 + $0x50] sm:$0xf0]  ;;  %v1367_v1 = vld [vmem:[#allocation8 + $0x48] sm:$0xf]  ;;  %v1360_v5 = vor.u32 %v1600_v61, %v1359_v60 }
  0x41   : > { %532 = vmatpush.bf16.msra.mxu0 %v1392_v45  ;;  %v1601_v2 = vld [vmem:[#allocation8 + $0x54] sm:$0xf0]  ;;  %v1599_v3 = vld [vmem:[#allocation8 + $0x4c] sm:$0xf]  ;;  %v1369_v4 = vld [vmem:[#allocation8 + $0x58] sm:$0xf0]  ;;  %v1364_v6 = vor.u32 %v1598_v62, %v1361_v0 }
  0x42   : > { %551 = vmatpush.bf16.msra.mxu1 %v1396_v46  ;;  %570 = vmatpush.bf16.msra.mxu2 %v1400_v47  ;;  %v1368_v7 = vor.u32 %v1601_v2, %v1367_v1  ;;  %v1343_v8 = vld [vmem:[#allocation8 + $0x20] sm:$0xf]  ;;  %v1596_v9 = vld [vmem:[#allocation8 + $0x2c] sm:$0xf0]  ;;  %v1594_v10 = vld [vmem:[#allocation8 + $0x24] sm:$0xf]  ;;  %v1372_v11 = vor.u32 %v1599_v3, %v1369_v4 }
  0x43   : > { %589 = vmatpush.bf16.msra.mxu3 %v1404_v51  ;;  %v1345_v12 = vld [vmem:[#allocation8 + $0x30] sm:$0xf0]  ;;  %v1351_v13 = vld [vmem:[#allocation8 + $0x28] sm:$0xf]  ;;  %v1597_v14 = vld [vmem:[#allocation8 + $0x34] sm:$0xf0]  ;;  %v1344_v17 = vor.u32 %v1596_v9, %v1343_v8 }
  0x44   : > { %v1595_v15 = vld [vmem:[#allocation8 + $0x2c] sm:$0xf]  ;;  %v1353_v16 = vld [vmem:[#allocation8 + $0x38] sm:$0xf0]  ;;  %v1327_v18 = vld [vmem:[#allocation8] sm:$0xf]  ;;  %v1348_v19 = vor.u32 %v1594_v10, %v1345_v12  ;;  %v1352_v20 = vor.u32 %v1597_v14, %v1351_v13 }
  0x45   : > { %533 = vmatpush.bf16.msra.mxu0 %v1376_v57  ;;  %v1592_v21 = vld [vmem:[#allocation8 + $0xc] sm:$0xf0]  ;;  %v1590_v22 = vld [vmem:[#allocation8 + $0x4] sm:$0xf]  ;;  %v1329_v23 = vld [vmem:[#allocation8 + $0x10] sm:$0xf0]  ;;  %v1356_v24 = vor.u32 %v1595_v15, %v1353_v16 }
  0x46   : > { %552 = vmatpush.bf16.msra.mxu1 %v1380_v58  ;;  %571 = vmatpush.bf16.msra.mxu2 %v1384_v59  ;;  %v1335_v25 = vld [vmem:[#allocation8 + $0x8] sm:$0xf]  ;;  %v1593_v26 = vld [vmem:[#allocation8 + $0x14] sm:$0xf0]  ;;  %v1591_v27 = vld [vmem:[#allocation8 + $0xc] sm:$0xf]  ;;  %v1328_v31 = vor.u32 %v1592_v21, %v1327_v18  ;;  %v1332_v34 = vor.u32 %v1590_v22, %v1329_v23 }
  0x47   : > { %590 = vmatpush.bf16.msra.mxu3 %v1388_v63  ;;  %v1337_v28 = vld [vmem:[#allocation8 + $0x18] sm:$0xf0]  ;;  %v1568_v29 = vld [vmem:[#allocation10 + $0xe0] sm:$0xf]  ;;  %v1652_v30 = vld [vmem:[#allocation10 + $0xec] sm:$0xf0]  ;;  %v1336_v35 = vor.u32 %v1593_v26, %v1335_v25 }
  0x48   : > { %v1650_v32 = vld [vmem:[#allocation10 + $0xe4] sm:$0xf]  ;;  %v1570_v33 = vld [vmem:[#allocation10 + $0xf0] sm:$0xf0]  ;;  %v1340_v37 = vor.u32 %v1591_v27, %v1337_v28  ;;  %v2103_v38 = vor.u32 %v1652_v30, %v1568_v29  ;;  %v1576_v39 = vld [vmem:[#allocation10 + $0xe8] sm:$0xf] }
  0x49   : > { %534 = vmatpush.bf16.msra.mxu0 %v1360_v5  ;;  %v1588_v36 = vld [vmem:[%s263_s29] sm:$0xff]  ;;  %v1653_v40 = vld [vmem:[#allocation10 + $0xf4] sm:$0xf0]  ;;  %v1651_v41 = vld [vmem:[#allocation10 + $0xec] sm:$0xf]  ;;  %v2105_v42 = vor.u32 %v1650_v32, %v1570_v33  ;;  %s2121_s24 = sshll.u32 %s1953_s21, 2 }
  0x4a   : > { %553 = vmatpush.bf16.msra.mxu1 %v1364_v6  ;;  %572 = vmatpush.bf16.msra.mxu2 %v1368_v7  ;;  %v1578_v43 = vld [vmem:[#allocation10 + $0xf8] sm:$0xf0]  ;;  %v1552_v44 = vld [vmem:[#allocation10 + $0xc0] sm:$0xf]  ;;  %v1648_v45 = vld [vmem:[#allocation10 + $0xcc] sm:$0xf0]  ;;  %v2107_v48 = vor.u32 %v1653_v40, %v1576_v39  ;;  %v899_v15 = vstv %s2121_s24 }
  0x4b   : > { %591 = vmatpush.bf16.msra.mxu3 %v1372_v11  ;;  %v1646_v46 = vld [vmem:[#allocation10 + $0xc4] sm:$0xf]  ;;  %v1554_v47 = vld [vmem:[#allocation10 + $0xd0] sm:$0xf0]  ;;  %v2110_v49 = vor.u32 %v1651_v41, %v1578_v43  ;;  %v2112_v50 = vor.u32 %v1648_v45, %v1552_v44  ;;  %v1560_v51 = vld [vmem:[#allocation10 + $0xc8] sm:$0xf] }
  0x4c   : > { %v1649_v52 = vld [vmem:[#allocation10 + $0xd4] sm:$0xf0]  ;;  %v1647_v53 = vld [vmem:[#allocation10 + $0xcc] sm:$0xf]  ;;  %v2115_v54 = vor.u32 %v1646_v46, %v1554_v47  ;;  %v1562_v55 = vld [vmem:[#allocation10 + $0xd8] sm:$0xf0] }
  0x4d   : > { %535 = vmatpush.bf16.msra.mxu0 %v1344_v17  ;;  %v1536_v56 = vld [vmem:[#allocation10 + $0xa0] sm:$0xf]  ;;  %v1644_v57 = vld [vmem:[#allocation10 + $0xac] sm:$0xf0]  ;;  %v1642_v58 = vld [vmem:[#allocation10 + $0xa4] sm:$0xf]  ;;  %v2118_v60 = vor.u32 %v1649_v52, %v1560_v51  ;;  %v2125_v61 = vor.u32 %v1647_v53, %v1562_v55 }
  0x4e   : > { %554 = vmatpush.bf16.msra.mxu1 %v1348_v19  ;;  %573 = vmatpush.bf16.msra.mxu2 %v1352_v20  ;;  %v1538_v59 = vld [vmem:[#allocation10 + $0xb0] sm:$0xf0]  ;;  %v2127_v62 = vor.u32 %v1644_v57, %v1536_v56  ;;  %v1544_v63 = vld [vmem:[#allocation10 + $0xa8] sm:$0xf]  ;;  %v1645_v0 = vld [vmem:[#allocation10 + $0xb4] sm:$0xf0] }
  0x4f   : > { %592 = vmatpush.bf16.msra.mxu3 %v1356_v24  ;;  %v1643_v1 = vld [vmem:[#allocation10 + $0xac] sm:$0xf]  ;;  %v2130_v2 = vor.u32 %v1642_v58, %v1538_v59  ;;  %v1546_v3 = vld [vmem:[#allocation10 + $0xb8] sm:$0xf0]  ;;  %v1520_v4 = vld [vmem:[#allocation10 + $0x80] sm:$0xf]  ;;  %v2133_v8 = vor.u32 %v1645_v0, %v1544_v63 }
  0x50   : > { %v1640_v5 = vld [vmem:[#allocation10 + $0x8c] sm:$0xf0]  ;;  %v1638_v6 = vld [vmem:[#allocation10 + $0x84] sm:$0xf]  ;;  %v1522_v7 = vld [vmem:[#allocation10 + $0x90] sm:$0xf0]  ;;  %v2137_v10 = vor.u32 %v1643_v1, %v1546_v3 }
  0x51   : > { %536 = vmatpush.bf16.msra.mxu0 %v1328_v31  ;;  %v1528_v9 = vld [vmem:[#allocation10 + $0x88] sm:$0xf]  ;;  %v2139_v11 = vor.u32 %v1640_v5, %v1520_v4  ;;  %v1641_v12 = vld [vmem:[#allocation10 + $0x94] sm:$0xf0]  ;;  %v1639_v13 = vld [vmem:[#allocation10 + $0x8c] sm:$0xf]  ;;  %v2143_v16 = vor.u32 %v1638_v6, %v1522_v7 }
  0x52   : > { %555 = vmatpush.bf16.msra.mxu1 %v1332_v34  ;;  %574 = vmatpush.bf16.msra.mxu2 %v1336_v35  ;;  %v1530_v14 = vld [vmem:[#allocation10 + $0x98] sm:$0xf0]  ;;  %v1504_v17 = vld [vmem:[#allocation10 + $0x60] sm:$0xf]  ;;  %v1636_v18 = vld [vmem:[#allocation10 + $0x6c] sm:$0xf0]  ;;  %v2152_v22 = vor.u32 %v1641_v12, %v1528_v9 }
  0x53   : > { %593 = vmatpush.bf16.msra.mxu3 %v1340_v37  ;;  %s990_s25 = sadd.s32 1, %s2121_s24  ;;  %v1634_v19 = vld [vmem:[#allocation10 + $0x64] sm:$0xf]  ;;  %v1506_v20 = vld [vmem:[#allocation10 + $0x70] sm:$0xf0]  ;;  %v2405_v24 = vmov 0   ;;  %v2158_v25 = vor.u32 %v1639_v13, %v1530_v14  ;;  %v2162_v27 = vor.u32 %v1636_v18, %v1504_v17 }
  0x54   : > { %537 = vmatmul.bf16.vlgmr.msra.gmra.mxu0 %v1588_v36  ;;  %v2149_v21 = vld [vmem:[%s2398_s0] sm:$0xff]  ;;  %v1512_v23 = vld [vmem:[#allocation10 + $0x68] sm:$0xf]  ;;  %1743 = vset.pattern.permute.xlu0 %v2405_v24  ;;  %v1637_v28 = vld [vmem:[#allocation10 + $0x74] sm:$0xf0]  ;;  %v991_v31 = vstv %s990_s25  ;;  %v2166_v32 = vor.u32 %v1634_v19, %v1506_v20  ;;  %s1082_s7 = sadd.s32 2, %s2121_s24 }
  0x55   : > { %825 = vmatpush.bf16.msrb.mxu0 %v2103_v38  ;;  %556 = vmatmul.bf16.vlgmr.msra.gmra.mxu1 %v1588_v36  ;;  %vm900_vm0 = vcmp.lt.s32.totalorder %v899_v15, %v2149_v21  ;;  %v1589_v26 = vld [vmem:[%s263_s29 + $0x8] sm:$0xff]  ;;  %v1488_v34 = vld [vmem:[#allocation10 + $0x40] sm:$0xf]  ;;  %v1632_v35 = vld [vmem:[#allocation10 + $0x4c] sm:$0xf0]  ;;  %v2170_v39 = vor.u32 %v1637_v28, %v1512_v23  ;;  %vm992_vm1 = vcmp.lt.s32.totalorder %v991_v31, %v2149_v21  ;;  %s1174_s8 = sadd.s32 3, %s2121_s24 }
  0x56   : > { %838 = vmatpush.bf16.msrb.mxu1 %v2105_v42  ;;  %575 = vmatmul.bf16.vlgmr.msra.gmra.mxu2 %v1588_v36  ;;  %v1635_v29 = vld [vmem:[#allocation10 + $0x6c] sm:$0xf]  ;;  %v901_v30 = vsel %vm900_vm0, 1, %v2405_v24  ;;  %v1514_v33 = vld [vmem:[#allocation10 + $0x78] sm:$0xf0]  ;;  %v2177_v41 = vor.u32 %v1632_v35, %v1488_v34  ;;  %v993_v56 = vsel %vm992_vm1, 1, %v2405_v24 }
  0x57   : > { %594 = vmatmul.bf16.vlgmr.msra.gmra.mxu3 %v1588_v36  ;;  %851 = vmatpush.bf16.msrb.mxu2 %v2107_v48  ;;  %v1630_v36 = vld [vmem:[#allocation10 + $0x44] sm:$0xf]  ;;  %v1490_v37 = vld [vmem:[#allocation10 + $0x50] sm:$0xf0]  ;;  %v2175_v40 = vor.u32 %v1635_v29, %v1514_v33  ;;  %v1496_v43 = vld [vmem:[#allocation10 + $0x48] sm:$0xf] }
  0x58   : > { %864 = vmatpush.bf16.msrb.mxu3 %v2110_v49  ;;  %903 = vperm.xlu0 %1743, %v901_v30   ;;  %v1633_v44 = vld [vmem:[#allocation10 + $0x54] sm:$0xf0]  ;;  %v1631_v45 = vld [vmem:[#allocation10 + $0x4c] sm:$0xf]  ;;  %v2180_v46 = vor.u32 %v1630_v36, %v1490_v37  ;;  %v1498_v47 = vld [vmem:[#allocation10 + $0x58] sm:$0xf0] }
  0x59   : > { %826 = vmatpush.bf16.msrb.mxu0 %v2112_v50  ;;  %1744 = vset.pattern.permute.xlu1 %v2405_v24  ;;  %v1472_v51 = vld [vmem:[#allocation10 + $0x20] sm:$0xf]  ;;  %v1628_v52 = vld [vmem:[#allocation10 + $0x2c] sm:$0xf0]  ;;  %v1626_v53 = vld [vmem:[#allocation10 + $0x24] sm:$0xf]  ;;  %v2186_v57 = vor.u32 %v1633_v44, %v1496_v43  ;;  %v2190_v58 = vor.u32 %v1631_v45, %v1498_v47 }
  0x5a   : > { %839 = vmatpush.bf16.msrb.mxu1 %v2115_v54  ;;  %v1474_v55 = vld [vmem:[#allocation10 + $0x30] sm:$0xf0]  ;;  %v2192_v59 = vor.u32 %v1628_v52, %v1472_v51  ;;  %v1480_v63 = vld [vmem:[#allocation10 + $0x28] sm:$0xf]  ;;  %v1629_v0 = vld [vmem:[#allocation10 + $0x34] sm:$0xf0] }
  0x5b   : > { %852 = vmatpush.bf16.msrb.mxu2 %v2118_v60  ;;  %v1627_v1 = vld [vmem:[#allocation10 + $0x2c] sm:$0xf]  ;;  %v2195_v3 = vor.u32 %v1626_v53, %v1474_v55  ;;  %v1482_v4 = vld [vmem:[#allocation10 + $0x38] sm:$0xf0]  ;;  %v1456_v5 = vld [vmem:[#allocation10] sm:$0xf]  ;;  %v2198_v12 = vor.u32 %v1629_v0, %v1480_v63 }
  0x5c   : > { %865 = vmatpush.bf16.msrb.mxu3 %v2125_v61  ;;  %v1624_v6 = vld [vmem:[#allocation10 + $0xc] sm:$0xf0]  ;;  %v1622_v7 = vld [vmem:[#allocation10 + $0x4] sm:$0xf]  ;;  %v1458_v9 = vld [vmem:[#allocation10 + $0x10] sm:$0xf0]  ;;  %v2202_v13 = vor.u32 %v1627_v1, %v1482_v4 }
  0x5d   : > { %827 = vmatpush.bf16.msrb.mxu0 %v2127_v62  ;;  %v2204_v14 = vor.u32 %v1624_v6, %v1456_v5  ;;  %v1464_v15 = vld [vmem:[#allocation10 + $0x8] sm:$0xf]  ;;  %v1625_v17 = vld [vmem:[#allocation10 + $0x14] sm:$0xf0]  ;;  %v2207_v18 = vor.u32 %v1622_v7, %v1458_v9  ;;  %v1623_v19 = vld [vmem:[#allocation10 + $0xc] sm:$0xf] }
  0x5e   : > { %840 = vmatpush.bf16.msrb.mxu1 %v2130_v2  ;;  %v1466_v20 = vld [vmem:[#allocation10 + $0x18] sm:$0xf0]  ;;  %v2209_v23 = vld [vmem:[#allocation3] sm:$0xff]  ;;  %p1582_p1 = scmp.ne.s32.totalorder %s1953_s21, 1 }
  0x5f   : > { %853 = vmatpush.bf16.msrb.mxu2 %v2133_v8  ;;  %v2216_v28 = vor.u32 %v1623_v19, %v1466_v20  ;;  %v632_v29 = vpack.c.bf16 %v2209_v23, %v2209_v23  ;;  %v347_v33 = vld [vmem:[%s2402_s4] sm:$0xf] }
  0x60   : > { %866 = vmatpush.bf16.msrb.mxu3 %v2137_v10  ;;  %995 = vperm.xlu0 %1743, %v993_v56   ;;  %v349_v34 = vperm.slane %v347_v33, 0  ;;  %v350_v36 = vperm.slane %v347_v33, 1  ;;  %v351_v51 = vperm.slane %v347_v33, 2  ;;  %v352_v52 = vperm.slane %v347_v33, 3 }
  0x61   : > { %828 = vmatpush.bf16.msrb.mxu0 %v2139_v11 }
  0x62   : > { %841 = vmatpush.bf16.msrb.mxu1 %v2143_v16 }
  0x63   : > { %854 = vmatpush.bf16.msrb.mxu2 %v2152_v22 }
  0x64   : > { %867 = vmatpush.bf16.msrb.mxu3 %v2158_v25  ;;  %542 = vmatmul.bf16.gmra.mxu0 %v1589_v26 }
  0x65   : > { %829 = vmatpush.bf16.msrb.mxu0 %v2162_v27  ;;  %561 = vmatmul.bf16.gmra.mxu1 %v1589_v26 }
  0x66   : > { %842 = vmatpush.bf16.msrb.mxu1 %v2166_v32  ;;  %580 = vmatmul.bf16.gmra.mxu2 %v1589_v26 }
  0x67   : > { %599 = vmatmul.bf16.gmra.mxu3 %v1589_v26  ;;  %855 = vmatpush.bf16.msrb.mxu2 %v2170_v39  ;;  %v2212_v26 = vor.u32 %v1625_v17, %v1464_v15 }
  0x68   : > { %868 = vmatpush.bf16.msrb.mxu3 %v2175_v40 }
  0x69   : > { %830 = vmatpush.bf16.msrb.mxu0 %v2177_v41 }
  0x6a   : > { %843 = vmatpush.bf16.msrb.mxu1 %v2180_v46 }
  0x6b   : > { %856 = vmatpush.bf16.msrb.mxu2 %v2186_v57 }
  0x6c   : > { %869 = vmatpush.bf16.msrb.mxu3 %v2190_v58 }
  0x6d   : > { %831 = vmatpush.bf16.msrb.mxu0 %v2192_v59 }
  0x6e   : > { %844 = vmatpush.bf16.msrb.mxu1 %v2195_v3 }
  0x6f   : > { %857 = vmatpush.bf16.msrb.mxu2 %v2198_v12 }
  0x70   : > { %870 = vmatpush.bf16.msrb.mxu3 %v2202_v13 }
  0x71   : > { %832 = vmatpush.bf16.msrb.mxu0 %v2204_v14 }
  0x72   : > { %845 = vmatpush.bf16.msrb.mxu1 %v2207_v18 }
  0x73   : > { %858 = vmatpush.bf16.msrb.mxu2 %v2212_v26 }
  0x74   : > { %871 = vmatpush.bf16.msrb.mxu3 %v2216_v28  ;;  %833 = vmatmul.bf16.vlgmr.msrb.gmra.mxu0 %v632_v29 }
  0x75   : > { %916 = vmatpush.bf16.msra.mxu0 %v2103_v38  ;;  %846 = vmatmul.bf16.vlgmr.msrb.gmra.mxu1 %v632_v29 }
  0x76   : > { %929 = vmatpush.bf16.msra.mxu1 %v2105_v42  ;;  %859 = vmatmul.bf16.vlgmr.msrb.gmra.mxu2 %v632_v29 }
  0x77   : > { %942 = vmatpush.bf16.msra.mxu2 %v2107_v48  ;;  %872 = vmatmul.bf16.vlgmr.msrb.gmra.mxu3 %v632_v29 }
  0x78   : > { %955 = vmatpush.bf16.msra.mxu3 %v2110_v49 }
  0x79   : > { %917 = vmatpush.bf16.msra.mxu0 %v2112_v50 }
  0x7a   : > { %930 = vmatpush.bf16.msra.mxu1 %v2115_v54 }
  0x7b   : > { %943 = vmatpush.bf16.msra.mxu2 %v2118_v60 }
  0x7c   : > { %956 = vmatpush.bf16.msra.mxu3 %v2125_v61 }
  0x7d   : > { %918 = vmatpush.bf16.msra.mxu0 %v2127_v62 }
  0x7e   : > { %931 = vmatpush.bf16.msra.mxu1 %v2130_v2 }
  0x7f   : > { %944 = vmatpush.bf16.msra.mxu2 %v2133_v8 }
  0x80   : > { %957 = vmatpush.bf16.msra.mxu3 %v2137_v10 }
  0x81   : > { %919 = vmatpush.bf16.msra.mxu0 %v2139_v11 }
  0x82   : > { %932 = vmatpush.bf16.msra.mxu1 %v2143_v16 }
  0x83   : > { %945 = vmatpush.bf16.msra.mxu2 %v2152_v22 }
  0x84   : > { %958 = vmatpush.bf16.msra.mxu3 %v2158_v25 }
  0x85   : > { %920 = vmatpush.bf16.msra.mxu0 %v2162_v27 }
  0x86   : > { %933 = vmatpush.bf16.msra.mxu1 %v2166_v32 }
  0x87   : > { %946 = vmatpush.bf16.msra.mxu2 %v2170_v39 }
  0x88   : > { %959 = vmatpush.bf16.msra.mxu3 %v2175_v40 }
  0x89   : > { %921 = vmatpush.bf16.msra.mxu0 %v2177_v41 }
  0x8a   : > { %934 = vmatpush.bf16.msra.mxu1 %v2180_v46 }
  0x8b   : > { %947 = vmatpush.bf16.msra.mxu2 %v2186_v57 }
  0x8c   : > { %960 = vmatpush.bf16.msra.mxu3 %v2190_v58 }
  0x8d   : > { %922 = vmatpush.bf16.msra.mxu0 %v2192_v59 }
  0x8e   : > { %935 = vmatpush.bf16.msra.mxu1 %v2195_v3 }
  0x8f   : > { %948 = vmatpush.bf16.msra.mxu2 %v2198_v12 }
  0x90   : > { %961 = vmatpush.bf16.msra.mxu3 %v2202_v13 }
  0x91   : > { %923 = vmatpush.bf16.msra.mxu0 %v2204_v14 }
  0x92   : > { %936 = vmatpush.bf16.msra.mxu1 %v2207_v18 }
  0x93   : > { %949 = vmatpush.bf16.msra.mxu2 %v2212_v26 }
  0x94   : > { %962 = vmatpush.bf16.msra.mxu3 %v2216_v28 }
  0x95   : > { %1008 = vmatpush.bf16.msrb.mxu0 %v2103_v38 }
  0x96   : > { %1021 = vmatpush.bf16.msrb.mxu1 %v2105_v42 }
  0x97   : > { %1034 = vmatpush.bf16.msrb.mxu2 %v2107_v48 }
  0x98   : > { %1047 = vmatpush.bf16.msrb.mxu3 %v2110_v49 }
  0x99   : > { %1009 = vmatpush.bf16.msrb.mxu0 %v2112_v50 }
  0x9a   : > { %1022 = vmatpush.bf16.msrb.mxu1 %v2115_v54 }
  0x9b   : > { %1035 = vmatpush.bf16.msrb.mxu2 %v2118_v60 }
  0x9c   : > { %1048 = vmatpush.bf16.msrb.mxu3 %v2125_v61 }
  0x9d   : > { %1010 = vmatpush.bf16.msrb.mxu0 %v2127_v62 }
  0x9e   : > { %1023 = vmatpush.bf16.msrb.mxu1 %v2130_v2 }
  0x9f   : > { %1036 = vmatpush.bf16.msrb.mxu2 %v2133_v8 }
  0xa0   : > { %1049 = vmatpush.bf16.msrb.mxu3 %v2137_v10 }
  0xa1   : > { %1011 = vmatpush.bf16.msrb.mxu0 %v2139_v11 }
  0xa2   : > { %1024 = vmatpush.bf16.msrb.mxu1 %v2143_v16 }
  0xa3   : > { %1037 = vmatpush.bf16.msrb.mxu2 %v2152_v22 }
  0xa4   : > { %1050 = vmatpush.bf16.msrb.mxu3 %v2158_v25 }
  0xa5   : > { %1012 = vmatpush.bf16.msrb.mxu0 %v2162_v27 }
  0xa6   : > { %1025 = vmatpush.bf16.msrb.mxu1 %v2166_v32 }
  0xa7   : > { %1038 = vmatpush.bf16.msrb.mxu2 %v2170_v39 }
  0xa8   : > { %1051 = vmatpush.bf16.msrb.mxu3 %v2175_v40 }
  0xa9   : > { %1013 = vmatpush.bf16.msrb.mxu0 %v2177_v41 }
  0xaa   : > { %1026 = vmatpush.bf16.msrb.mxu1 %v2180_v46 }
  0xab   : > { %1039 = vmatpush.bf16.msrb.mxu2 %v2186_v57 }
  0xac   : > { %1052 = vmatpush.bf16.msrb.mxu3 %v2190_v58 }
  0xad   : > { %1014 = vmatpush.bf16.msrb.mxu0 %v2192_v59 }
  0xae   : > { %1027 = vmatpush.bf16.msrb.mxu1 %v2195_v3 }
  0xaf   : > { %1040 = vmatpush.bf16.msrb.mxu2 %v2198_v12 }
  0xb0   : > { %1053 = vmatpush.bf16.msrb.mxu3 %v2202_v13 }
  0xb1   : > { %1015 = vmatpush.bf16.msrb.mxu0 %v2204_v14 }
  0xb2   : > { %1028 = vmatpush.bf16.msrb.mxu1 %v2207_v18 }
  0xb3   : > { %1041 = vmatpush.bf16.msrb.mxu2 %v2212_v26 }
  0xb4   : > { %1054 = vmatpush.bf16.msrb.mxu3 %v2216_v28 }
  0xd1   : > { %v538_v30 = vpop.f32.mrf.mxu0 }
  0xd2   : > { %v557_v31 = vpop.f32.mrf.mxu1  ;;  %v539_v33 = vadd.f32 %v538_v30, %v349_v34 }
  0xd9   : > { %v576_v35 = vpop.f32.mrf.mxu2  ;;  %v540_v43 = vpop.f32.mrf.mxu0 }
  0xda   : > { %v595_v37 = vpop.f32.mrf.mxu3  ;;  %v2290_v44 = vadd.f32 %v540_v43, %v349_v34  ;;  %v559_v45 = vpop.f32.mrf.mxu1 }
  0xdb   : > { %v2292_v47 = vadd.f32 %v559_v45, %v350_v36  ;;  %v558_v45 = vadd.f32 %v557_v31, %v350_v36 }
  0xe1   : > { %v578_v53 = vpop.f32.mrf.mxu2  ;;  %v543_v63 = vpop.f32.mrf.mxu0 }
  0xe2   : > { %v2294_v55 = vadd.f32 %v578_v53, %v351_v51  ;;  %v597_v56 = vpop.f32.mrf.mxu3  ;;  %v2298_v1 = vadd.f32 %v543_v63, %v349_v34  ;;  %v562_v4 = vpop.f32.mrf.mxu1 }
  0xe3   : > { %v2296_v0 = vadd.f32 %v597_v56, %v352_v52  ;;  %v2300_v5 = vadd.f32 %v562_v4, %v350_v36 }
  0xe5   : > { %2411 = vst [vmem:[#allocation15_spill] sm:$0xff] %v2300_v5 }
  0xe9   : > { %v581_v6 = vpop.f32.mrf.mxu2  ;;  %v545_v15 = vpop.f32.mrf.mxu0 }
  0xea   : > { %v2302_v7 = vadd.f32 %v581_v6, %v351_v51  ;;  %v600_v9 = vpop.f32.mrf.mxu3  ;;  %v2306_v19 = vadd.f32 %v545_v15, %v349_v34  ;;  %v564_v20 = vpop.f32.mrf.mxu1  ;;  %v577_v15 = vadd.f32 %v576_v35, %v351_v51 }
  0xeb   : > { %v2304_v17 = vadd.f32 %v600_v9, %v352_v52  ;;  %v2308_v29 = vadd.f32 %v564_v20, %v350_v36  ;;  %v904_v35 = vpop.permute.xlu0 %903 }
  0xec   : > { %2412 = vst [vmem:[#allocation16_spill] sm:$0xff] %v2302_v7  ;;  %vm905_vm2 = vcmp.eq.s32.totalorder %v904_v35, 1 }
  0xed   : > { %2413 = vst [vmem:[#allocation17_spill] sm:$0xff] %v2306_v19  ;;  %v596_v19 = vadd.f32 %v595_v37, %v352_v52 }
  0xee   : > { %2414 = vst [vmem:[#allocation18_spill] sm:$0xff] %v2308_v29 }
  0xf1   : > { %v583_v43 = vpop.f32.mrf.mxu2  ;;  %v834_v63 = vpop.f32.mrf.mxu0 }
  0xf2   : > { %v2310_v53 = vadd.f32 %v583_v43, %v351_v51  ;;  %v602_v56 = vpop.f32.mrf.mxu3  ;;  %v877_v6 = vadd.f32 %v834_v63, %v539_v33  ;;  %v847_v24 = vpop.f32.mrf.mxu1 }
  0xf3   : > { %v2312_v4 = vadd.f32 %v602_v56, %v352_v52  ;;  %v878_v7 = vadd.f32 %v847_v24, %v558_v45  ;;  %v624_v45 = vld [vmem:[#allocation4] sm:$0xff]  ;;  %v2419_v35 = vld [vmem:[#allocation16_spill] sm:$0xff] }
  0xf4   : > { %2415 = vst [vmem:[#allocation19_spill] sm:$0xff] %v2310_v53  ;;  %v881_v5 = vmul.f32 0.5, %v877_v6 }
  0xf5   : > { %2416 = vst [vmem:[#allocation20_spill] sm:$0xff] %v2312_v4  ;;  %v885_v9 = vmul.f32 0.5, %v878_v7 }
  0xf6   : > { %1745 = vtanh.f32 %v881_v5 }
  0xf7   : > { %1747 = vtanh.f32 %v885_v9 }
  0xf9   : > { %v860_v20 = vpop.f32.mrf.mxu2  ;;  %v836_v34 = vpop.f32.mrf.mxu0 }
  0xfa   : > { %v879_v29 = vadd.f32 %v860_v20, %v577_v15  ;;  %v873_v30 = vpop.f32.mrf.mxu3  ;;  %v849_v36 = vpop.f32.mrf.mxu1 }
  0xfb   : > { %v880_v31 = vadd.f32 %v873_v30, %v596_v19 }
  0xfc   : > { %1749 = vtanh.f32 %v879_v29  ;;  %v1746_v43 = vpop.eup %1745 }
  0xfd   : > { %v890_v53 = vmul.f32 0.5, %v880_v31  ;;  %v1748_v56 = vpop.eup %1747  ;;  %v883_v4 = vmul.f32 0.5, %v1746_v43 }
  0xfe   : > { %v887_v33 = vmul.f32 0.5, %v1748_v56  ;;  %v2418_v56 = vld [vmem:[#allocation15_spill] sm:$0xff] }
  0xff   : > { %1751 = vtanh.f32 %v890_v53  ;;  %v884_v24 = vadd.f32 0.5, %v883_v4 }
 0x100   : > { %v888_v7 = vadd.f32 0.5, %v887_v33 }
 0x101   : > { %v862_v5 = vpop.f32.mrf.mxu2 }
 0x102   : > { %v1750_v51 = vpop.eup %1749  ;;  %v875_v37 = vpop.f32.mrf.mxu3  ;;  %v894_v63 = vmul.f32 %v888_v7, %v624_v45 }
 0x103   : > { %v895_v52 = vmul.f32 %v1750_v51, %v884_v24 }
 0x105   : > { %v1752_v6 = vpop.eup %1751  ;;  %v896_v19 = vadd.f32 %v895_v52, %v894_v63 }
 0x106   : > { %v892_v9 = vmul.f32 0.5, %v1752_v6 }
 0x107   : > { %1753 = vtanh.f32 %v896_v19  ;;  %v2314_v29 = vsel %vm905_vm2, %v896_v19, %v624_v45 }
 0x108   : > { %v893_v15 = vadd.f32 0.5, %v892_v9 }
 0x10d   : > { %v1754_v20 = vpop.eup %1753 }
 0x10e   : > { %v898_v30 = vmul.f32 %v1754_v20, %v893_v15 }
 0x110   : > { %v2317_v53 = vsel %vm905_vm2, %v898_v30, %v2209_v23 }
 0x111   : > { %v915_v4 = vpack.c.bf16 %v2317_v53, %v2317_v53 }
 0x113   : > { %924 = vmatmul.bf16.vlgmr.msra.gmra.mxu0 %v915_v4  ;;  %937 = vmatmul.bf16.vlgmr.msra.gmra.mxu1 %v915_v4 }
 0x114   : > { %950 = vmatmul.bf16.vlgmr.msra.gmra.mxu2 %v915_v4  ;;  %963 = vmatmul.bf16.vlgmr.msra.gmra.mxu3 %v915_v4 }
 0x115   : > { %1100 = vmatpush.bf16.msra.mxu0 %v2103_v38  ;;  %1113 = vmatpush.bf16.msra.mxu1 %v2105_v42 }
 0x116   : > { %1126 = vmatpush.bf16.msra.mxu2 %v2107_v48  ;;  %1139 = vmatpush.bf16.msra.mxu3 %v2110_v49 }
 0x119   : > { %1101 = vmatpush.bf16.msra.mxu0 %v2112_v50  ;;  %1114 = vmatpush.bf16.msra.mxu1 %v2115_v54  ;;  %v1083_v50 = vstv %s1082_s7 }
 0x11a   : > { %1127 = vmatpush.bf16.msra.mxu2 %v2118_v60  ;;  %1140 = vmatpush.bf16.msra.mxu3 %v2125_v61  ;;  %vm1084_vm3 = vcmp.lt.s32.totalorder %v1083_v50, %v2149_v21  ;;  %v2417_v61 = vmov 0  }
 0x11d   : > { %1102 = vmatpush.bf16.msra.mxu0 %v2127_v62  ;;  %1115 = vmatpush.bf16.msra.mxu1 %v2130_v2  ;;  %v1085_v62 = vsel %vm1084_vm3, 1, %v2417_v61  ;;  %v1175_v2 = vstv %s1174_s8 }
 0x11e   : > { %1128 = vmatpush.bf16.msra.mxu2 %v2133_v8  ;;  %1141 = vmatpush.bf16.msra.mxu3 %v2137_v10  ;;  %vm1176_vm4 = vcmp.lt.s32.totalorder %v1175_v2, %v2149_v21 }
 0x11f   : > { %1087 = vperm.xlu1 %1744, %v1085_v62  }
 0x121   : > { %1103 = vmatpush.bf16.msra.mxu0 %v2139_v11  ;;  %1116 = vmatpush.bf16.msra.mxu1 %v2143_v16 }
 0x122   : > { %1129 = vmatpush.bf16.msra.mxu2 %v2152_v22  ;;  %1142 = vmatpush.bf16.msra.mxu3 %v2158_v25 }
 0x125   : > { %1104 = vmatpush.bf16.msra.mxu0 %v2162_v27  ;;  %1117 = vmatpush.bf16.msra.mxu1 %v2166_v32  ;;  %v1177_v32 = vsel %vm1176_vm4, 1, %v2417_v61 }
 0x126   : > { %1130 = vmatpush.bf16.msra.mxu2 %v2170_v39  ;;  %1143 = vmatpush.bf16.msra.mxu3 %v2175_v40 }
 0x127   : > { %1179 = vperm.xlu1 %1744, %v1177_v32  }
 0x129   : > { %1105 = vmatpush.bf16.msra.mxu0 %v2177_v41  ;;  %1118 = vmatpush.bf16.msra.mxu1 %v2180_v46 }
 0x12a   : > { %1131 = vmatpush.bf16.msra.mxu2 %v2186_v57  ;;  %1144 = vmatpush.bf16.msra.mxu3 %v2190_v58 }
 0x12d   : > { %1106 = vmatpush.bf16.msra.mxu0 %v2192_v59  ;;  %1119 = vmatpush.bf16.msra.mxu1 %v2195_v3 }
 0x12e   : > { %1132 = vmatpush.bf16.msra.mxu2 %v2198_v12  ;;  %1145 = vmatpush.bf16.msra.mxu3 %v2202_v13  ;;  %v996_v12 = vpop.permute.xlu0 %995 }
 0x12f   : > { %vm997_vm5 = vcmp.eq.s32.totalorder %v996_v12, 1 }
 0x131   : > { %1107 = vmatpush.bf16.msra.mxu0 %v2204_v14  ;;  %1120 = vmatpush.bf16.msra.mxu1 %v2207_v18 }
 0x132   : > { %1133 = vmatpush.bf16.msra.mxu2 %v2212_v26  ;;  %1146 = vmatpush.bf16.msra.mxu3 %v2216_v28 }
 0x190   : > { %v925_v38 = vpop.f32.mrf.mxu0  ;;  %v938_v42 = vpop.f32.mrf.mxu1 }
 0x191   : > { %v968_v48 = vadd.f32 %v925_v38, %v2290_v44  ;;  %v969_v49 = vadd.f32 %v938_v42, %v2292_v47  ;;  %v1088_v20 = vpop.permute.xlu1 %1087 }
 0x192   : > { %vm1089_vm6 = vcmp.eq.s32.totalorder %v1088_v20, 1 }
 0x193   : > { %v972_v54 = vmul.f32 0.5, %v968_v48  ;;  %v976_v60 = vmul.f32 0.5, %v969_v49 }
 0x195   : > { %1755 = vtanh.f32 %v972_v54 }
 0x196   : > { %1757 = vtanh.f32 %v976_v60 }
 0x197   : > { %v951_v8 = vpop.f32.mrf.mxu2  ;;  %v964_v10 = vpop.f32.mrf.mxu3 }
 0x198   : > { %v970_v11 = vadd.f32 %v951_v8, %v2294_v55  ;;  %v971_v16 = vadd.f32 %v964_v10, %v2296_v0  ;;  %v927_v22 = vpop.f32.mrf.mxu0  ;;  %v940_v25 = vpop.f32.mrf.mxu1 }
 0x199   : > { %v2421_v25 = vld [vmem:[#allocation18_spill] sm:$0xff] }
 0x19a   : > { %1759 = vtanh.f32 %v970_v11  ;;  %v981_v27 = vmul.f32 0.5, %v971_v16  ;;  %v2420_v16 = vld [vmem:[#allocation17_spill] sm:$0xff] }
 0x19b   : > { %v1756_v39 = vpop.eup %1755 }
 0x19c   : > { %v1758_v40 = vpop.eup %1757  ;;  %v974_v41 = vmul.f32 0.5, %v1756_v39  ;;  %1761 = vtanh.f32 %v981_v27 }
 0x19d   : > { %v978_v46 = vmul.f32 0.5, %v1758_v40 }
 0x19e   : > { %v975_v57 = vadd.f32 0.5, %v974_v41 }
 0x19f   : > { %v979_v58 = vadd.f32 0.5, %v978_v46  ;;  %v953_v59 = vpop.f32.mrf.mxu2  ;;  %v966_v21 = vpop.f32.mrf.mxu3  ;;  %v2422_v46 = vld [vmem:[#allocation19_spill] sm:$0xff] }
 0x1a0   : > { %v1760_v3 = vpop.eup %1759 }
 0x1a1   : > { %v985_v13 = vmul.f32 %v979_v58, %v2314_v29  ;;  %v986_v14 = vmul.f32 %v1760_v3, %v975_v57  ;;  %v2423_v58 = vld [vmem:[#allocation20_spill] sm:$0xff] }
 0x1a2   : > { %v1762_v18 = vpop.eup %1761 }
 0x1a3   : > { %v987_v23 = vadd.f32 %v986_v14, %v985_v13  ;;  %v983_v28 = vmul.f32 0.5, %v1762_v18 }
 0x1a5   : > { %1763 = vtanh.f32 %v987_v23  ;;  %v999_v26 = vsel %vm997_vm5, %v987_v23, %v2314_v29  ;;  %v984_v44 = vadd.f32 0.5, %v983_v28 }
 0x1ab   : > { %v1764_v47 = vpop.eup %1763 }
 0x1ac   : > { %v989_v55 = vmul.f32 %v1764_v47, %v984_v44 }
 0x1ae   : > { %v998_v0 = vsel %vm997_vm5, %v989_v55, %v2317_v53 }
 0x1af   : > { %v1007_v34 = vpack.c.bf16 %v998_v0, %v998_v0 }
 0x1b1   : > { %1016 = vmatmul.bf16.vlgmr.msrb.gmra.mxu0 %v1007_v34  ;;  %1029 = vmatmul.bf16.vlgmr.msrb.gmra.mxu1 %v1007_v34 }
 0x1b2   : > { %1042 = vmatmul.bf16.vlgmr.msrb.gmra.mxu2 %v1007_v34  ;;  %1055 = vmatmul.bf16.vlgmr.msrb.gmra.mxu3 %v1007_v34 }
 0x22e   : > { %v1017_v31 = vpop.f32.mrf.mxu0  ;;  %v1030_v36 = vpop.f32.mrf.mxu1 }
 0x22f   : > { %v1060_v43 = vadd.f32 %v1017_v31, %v2298_v1  ;;  %v1061_v33 = vadd.f32 %v1030_v36, %v2418_v56 }
 0x231   : > { %v1064_v24 = vmul.f32 0.5, %v1060_v43  ;;  %v1068_v45 = vmul.f32 0.5, %v1061_v33 }
 0x233   : > { %1765 = vtanh.f32 %v1064_v24 }
 0x234   : > { %1767 = vtanh.f32 %v1068_v45 }
 0x235   : > { %v1043_v7 = vpop.f32.mrf.mxu2  ;;  %v1056_v5 = vpop.f32.mrf.mxu3 }
 0x236   : > { %v1062_v51 = vadd.f32 %v1043_v7, %v2419_v35  ;;  %v1063_v37 = vadd.f32 %v1056_v5, %v2304_v17  ;;  %v1019_v52 = vpop.f32.mrf.mxu0  ;;  %v1032_v63 = vpop.f32.mrf.mxu1 }
 0x238   : > { %1769 = vtanh.f32 %v1062_v51  ;;  %v1073_v6 = vmul.f32 0.5, %v1063_v37 }
 0x239   : > { %v1766_v19 = vpop.eup %1765 }
 0x23a   : > { %v1768_v29 = vpop.eup %1767  ;;  %v1066_v9 = vmul.f32 0.5, %v1766_v19  ;;  %1771 = vtanh.f32 %v1073_v6 }
 0x23b   : > { %v1070_v1 = vmul.f32 0.5, %v1768_v29 }
 0x23c   : > { %v1067_v15 = vadd.f32 0.5, %v1066_v9 }
 0x23d   : > { %v1071_v30 = vadd.f32 0.5, %v1070_v1  ;;  %v1045_v53 = vpop.f32.mrf.mxu2  ;;  %v1058_v4 = vpop.f32.mrf.mxu3 }
 0x23e   : > { %v1770_v38 = vpop.eup %1769 }
 0x23f   : > { %v1078_v42 = vmul.f32 %v1770_v38, %v1067_v15  ;;  %v1077_v48 = vmul.f32 %v1071_v30, %v999_v26 }
 0x240   : > { %v1772_v49 = vpop.eup %1771 }
 0x241   : > { %v1079_v17 = vadd.f32 %v1078_v42, %v1077_v48  ;;  %v1075_v54 = vmul.f32 0.5, %v1772_v49 }
 0x243   : > { %1773 = vtanh.f32 %v1079_v17  ;;  %v1091_v50 = vsel %vm1089_vm6, %v1079_v17, %v999_v26  ;;  %v1076_v60 = vadd.f32 0.5, %v1075_v54 }
 0x249   : > { %v1774_v61 = vpop.eup %1773 }
 0x24a   : > { %v1081_v62 = vmul.f32 %v1774_v61, %v1076_v60 }
 0x24c   : > { %v1090_v2 = vsel %vm1089_vm6, %v1081_v62, %v998_v0  ;;  %v1180_v0 = vpop.permute.xlu1 %1179 }
 0x24d   : > { %v1099_v8 = vpack.c.bf16 %v1090_v2, %v1090_v2  ;;  %vm1181_vm7 = vcmp.eq.s32.totalorder %v1180_v0, 1 }
 0x24f   : > { %1108 = vmatmul.bf16.vlgmr.msra.gmra.mxu0 %v1099_v8  ;;  %1121 = vmatmul.bf16.vlgmr.msra.gmra.mxu1 %v1099_v8 }
 0x250   : > { %1134 = vmatmul.bf16.vlgmr.msra.gmra.mxu2 %v1099_v8  ;;  %1147 = vmatmul.bf16.vlgmr.msra.gmra.mxu3 %v1099_v8 }
 0x2cc   : > { %v1109_v10 = vpop.f32.mrf.mxu0  ;;  %v1122_v11 = vpop.f32.mrf.mxu1 }
 0x2cd   : > { %v1152_v22 = vadd.f32 %v1109_v10, %v2420_v16  ;;  %v1153_v27 = vadd.f32 %v1122_v11, %v2421_v25 }
 0x2cf   : > { %v1156_v32 = vmul.f32 0.5, %v1152_v22  ;;  %v1160_v39 = vmul.f32 0.5, %v1153_v27 }
 0x2d1   : > { %1775 = vtanh.f32 %v1156_v32 }
 0x2d2   : > { %1777 = vtanh.f32 %v1160_v39 }
 0x2d3   : > { %v1135_v40 = vpop.f32.mrf.mxu2  ;;  %v1148_v41 = vpop.f32.mrf.mxu3 }
 0x2d4   : > { %v1154_v57 = vadd.f32 %v1135_v40, %v2422_v46  ;;  %v1155_v59 = vadd.f32 %v1148_v41, %v2423_v58  ;;  %v1111_v21 = vpop.f32.mrf.mxu0  ;;  %v1124_v3 = vpop.f32.mrf.mxu1 }
 0x2d6   : > { %1779 = vtanh.f32 %v1154_v57  ;;  %v1165_v12 = vmul.f32 0.5, %v1155_v59 }
 0x2d7   : > { %v1776_v13 = vpop.eup %1775 }
 0x2d8   : > { %v1778_v14 = vpop.eup %1777  ;;  %v1158_v18 = vmul.f32 0.5, %v1776_v13  ;;  %1781 = vtanh.f32 %v1165_v12 }
 0x2d9   : > { %v1162_v23 = vmul.f32 0.5, %v1778_v14 }
 0x2da   : > { %v1159_v26 = vadd.f32 0.5, %v1158_v18 }
 0x2db   : > { %v1163_v28 = vadd.f32 0.5, %v1162_v23  ;;  %v1137_v44 = vpop.f32.mrf.mxu2  ;;  %v1150_v47 = vpop.f32.mrf.mxu3 }
 0x2dc   : > { %v1780_v55 = vpop.eup %1779 }
 0x2dd   : > { %v1169_v34 = vmul.f32 %v1163_v28, %v1091_v50  ;;  %v1170_v31 = vmul.f32 %v1780_v55, %v1159_v26 }
 0x2de   : > { %v1782_v36 = vpop.eup %1781 }
 0x2df   : > { %v1171_v43 = vadd.f32 %v1170_v31, %v1169_v34  ;;  %v1167_v33 = vmul.f32 0.5, %v1782_v36 }
 0x2e1   : > { %1783 = vtanh.f32 %v1171_v43  ;;  %v1183_v56 = vsel %vm1181_vm7, %v1171_v43, %v1091_v50  ;;  %v1168_v24 = vadd.f32 0.5, %v1167_v33 }
 0x2e2   : > { %1185 = vst [vmem:[#allocation4] sm:$0xff] %v1183_v56 }
 0x2e7   : > { %v1784_v45 = vpop.eup %1783  ;;  %1189 = sbr.rel (%p1582_p1) target bundleno = 749 (0x2ed), region = 60 }
 0x2e8   : > { %v1173_v7 = vmul.f32 %v1784_v45, %v1168_v24 }
 0x2ea   : > { %v1182_v5 = vsel %vm1181_vm7, %v1173_v7, %v1090_v2 }
 0x2eb   : > { %1184 = vst [vmem:[#allocation3] sm:$0xff] %v1182_v5 }
 0x2ec   : > { %1190 = vst [vmem:[#allocation11] sm:$0xff] %v1182_v5 }
 0x2ed PF: > { %s2424_s9 = sadd.s32 4294967295, %s1961_s23   ;;  %s1201_s12 = sshll.u32 %s2403_s5, 4  ;;  %s1202_s12 = int_to_ptr.hbm [resolvable:$true] %s1201_s12 }
 0x2ee   : > { %p1684_p3 = scmp.eq.s32.totalorder %s2424_s9, 1  ;;  %s1971_s13 = smov [#allocation11]  }
 0x2ef   : > { %s1199_s14 = sshll.u32 %s1971_s13, 4  ;;  %s1200_s14 = int_to_ptr.vmem [resolvable:$true] %s1199_s14 }
 0x2f0   : > { %1665 = dma.vmem_to_hbm [thread:$0]  (%p1684_p3), %s1200_s14, 128, %s1202_s12, [#allocation7]  }
 0x2f1   : > { %1936 = dma.done.wait (%p1684_p3), [#allocation7], 128  }
 0x2f2   : > { %1938 = vsyncadd (%p1684_p3), [#allocation7], 4294967168 }
 0x2f3 PF: > { %s20_s23 = sadd.s32 1, %s1961_s23   ;;  %s2425_s18 = smov %s1945_s19 }
 0x2f4   : > { %p17_p4 = scmp.ge.s32.totalorder %s20_s23, 4   ;;  %s2426_s19 = smov %s1949_s20 }
 0x2f5   : > { %s2427_s20 = smov %s2077_s6  ;;  %s2428_s21 = smov %s1957_s22 }
 0x2f6   : > { %s2429_s22 = smov %s2431_s15  ;;  %19 = sbr.rel (!%p17_p4) target bundleno = 6 (0x6), region = 101 }
 0x2fb   :  { %1215 = vsyncpa [#allocation6], 1 }
 0x2fc   :  { %1217 = vsyncpa [#allocation6 + $0x1], 1 }
 0x2fd   :  { %1218 = vsyncpa [#allocation9], 1 }
 0x2fe   :  { %1219 = vsyncpa [#allocation7], 1 }
 0x2ff   :  { %1221 = vsyncpa [#allocation7 + $0x1], 1 }

</bundles_post_ra>
